<compile_context>
chip_gen: v7x
topology: tpu7x:2x2x1
jax: 0.10.0
libtpu: 0.0.40
codegen_flags: <defaults>
</compile_context>

<pallas_src>
import functools

import jax
import jax.numpy as jnp
from jax.experimental import pallas as pl
from jax.experimental.pallas import tpu as pltpu


def _round_up(x, m):
    return (x + m - 1) // m * m


# ----------------------------------------------------------------------------
# Kernel 1: fused matmul + bias (+ ReLU).  Used for both convs (via im2col).
# bf16 operands, f32 accumulation, single K step (K <= 100 here).
# ----------------------------------------------------------------------------
def _matmul_bias_act_kernel(a_ref, b_ref, bias_ref, o_ref, *, relu):
    acc = jnp.dot(a_ref[...], b_ref[...], preferred_element_type=jnp.float32)
    acc = acc + bias_ref[...]
    if relu:
        acc = jnp.maximum(acc, 0.0)
    o_ref[...] = acc.astype(o_ref.dtype)


def matmul_bias_act(a, b, bias, *, relu, out_dtype=jnp.bfloat16, block_m=128):
    """a: [M, K] (any float dtype), b: [K, N] bf16, bias: [1, N] f32 -> [M, N]."""
    M, K = a.shape
    K2, N = b.shape
    assert K == K2
    a = a.astype(jnp.bfloat16)

    if M > block_m:                       # tile M (conv1: M = N*24*24) -> parallel grid
        tm = block_m
        Mp = _round_up(M, tm)
        if Mp != M:
            a = jnp.pad(a, ((0, Mp - M), (0, 0)))
    else:                                 # single block (conv2 / tiny M)
        tm, Mp = M, M

    out = pl.pallas_call(
        functools.partial(_matmul_bias_act_kernel, relu=relu),
        out_shape=jax.ShapeDtypeStruct((Mp, N), out_dtype),
        grid=(Mp // tm,),
        in_specs=[
            pl.BlockSpec((tm, K), lambda i: (i, 0)),
            pl.BlockSpec((K, N), lambda i: (0, 0)),
            pl.BlockSpec((1, N), lambda i: (0, 0)),
        ],
        out_specs=pl.BlockSpec((tm, N), lambda i: (i, 0)),
        compiler_params=pltpu.CompilerParams(dimension_semantics=("parallel",)),
    )(a, b, bias)
    return out[:M] if Mp != M else out


# ----------------------------------------------------------------------------
# Kernel 2: elementwise max of the 4 disjoint windows of a 2x2/stride-2 pool.
# ----------------------------------------------------------------------------
def _max4_kernel(a_ref, b_ref, c_ref, d_ref, o_ref):
    o_ref[...] = jnp.maximum(jnp.maximum(a_ref[...], b_ref[...]),
                             jnp.maximum(c_ref[...], d_ref[...]))


def maxpool2x2(x):
    """x: [N, H, W, C] NHWC (H, W even) -> [N, H//2, W//2, C]."""
    N, H, W, C = x.shape
    OH, OW = H // 2, W // 2
    M = N * OH * OW
    # Non-overlapping windows -> 4 disjoint strided views, total bytes == input bytes.
    views = [
        x[:, 0::2, 0::2, :].reshape(M, C),
        x[:, 0::2, 1::2, :].reshape(M, C),
        x[:, 1::2, 0::2, :].reshape(M, C),
        x[:, 1::2, 1::2, :].reshape(M, C),
    ]
    out = pl.pallas_call(
        _max4_kernel,
        out_shape=jax.ShapeDtypeStruct((M, C), x.dtype),
        grid=(1,),
        in_specs=[pl.BlockSpec((M, C), lambda i: (0, 0)) for _ in range(4)],
        out_specs=pl.BlockSpec((M, C), lambda i: (0, 0)),
    )(*views)
    return out.reshape(N, OH, OW, C)


# ----------------------------------------------------------------------------
# Kernel 3: fused FC head -- fc1+ReLU, fc2+ReLU, fc3, log_softmax, one launch.
# ----------------------------------------------------------------------------
def _mlp_head_kernel(x_ref, w1_ref, b1_ref, w2_ref, b2_ref, w3_ref, b3_ref, o_ref):
    h = jnp.dot(x_ref[...], w1_ref[...], preferred_element_type=jnp.float32) + b1_ref[...]
    h = jnp.maximum(h, 0.0).astype(jnp.bfloat16)
    h = jnp.dot(h, w2_ref[...], preferred_element_type=jnp.float32) + b2_ref[...]
    h = jnp.maximum(h, 0.0).astype(jnp.bfloat16)
    logits = jnp.dot(h, w3_ref[...], preferred_element_type=jnp.float32) + b3_ref[...]
    m = jnp.max(logits, axis=-1, keepdims=True)
    lse = jnp.log(jnp.sum(jnp.exp(logits - m), axis=-1, keepdims=True)) + m
    o_ref[...] = (logits - lse).astype(o_ref.dtype)


def mlp_head(x, prep):
    M = x.shape[0]
    num_classes = prep["fc3_b"].shape[1]
    args = (x.astype(jnp.bfloat16),
            prep["fc1_w"], prep["fc1_b"],
            prep["fc2_w"], prep["fc2_b"],
            prep["fc3_w"], prep["fc3_b"])
    return pl.pallas_call(
        _mlp_head_kernel,
        out_shape=jax.ShapeDtypeStruct((M, num_classes), jnp.float32),
        grid=(1,),
        in_specs=[pl.BlockSpec(a.shape, lambda i: (0, 0)) for a in args],
        out_specs=pl.BlockSpec((M, num_classes), lambda i: (0, 0)),
    )(*args)


# ----------------------------------------------------------------------------
# im2col glue (pure data movement; conv FLOPs run in the Pallas matmul kernel).
# Patch feature order is (C, KH, KW), matching torch conv weight [OC, C, KH, KW].
# ----------------------------------------------------------------------------
def im2col(x, kh, kw):
    """stride 1, no padding (nn.Conv2d defaults used by CNN_FEMNIST)."""
    N, H, W, C = x.shape
    OH, OW = H - kh + 1, W - kw + 1
    cols = []
    for ki in range(kh):
        for kj in range(kw):
            cols.append(x[:, ki:ki + OH, kj:kj + OW, :])      # [N, OH, OW, C]
    p = jnp.stack(cols, axis=-1)                              # [N, OH, OW, C, kh*kw]
    p = p.reshape(N, OH, OW, C, kh, kw).reshape(N * OH * OW, C * kh * kw)
    return p, OH, OW


# ----------------------------------------------------------------------------
# Parameters: torch-layout init, then a ONE-TIME conversion to matmul-ready
# bf16 weights / f32 row-biases (outside the forward hot path).
# ----------------------------------------------------------------------------
def init_params(key, num_classes=10):
    ks = jax.random.split(key, 10)

    def w(k, shape, fan_in):
        return jax.random.normal(k, shape, jnp.float32) / jnp.sqrt(fan_in)

    return {
        "conv1_w": w(ks[0], (4, 1, 5, 5), 1 * 5 * 5),
        "conv1_b": 0.01 * jax.random.normal(ks[1], (4,), jnp.float32),
        "conv2_w": w(ks[2], (12, 4, 5, 5), 4 * 5 * 5),
        "conv2_b": 0.01 * jax.random.normal(ks[3], (12,), jnp.float32),
        "fc1_w": w(ks[4], (120, 12 * 4 * 4), 12 * 4 * 4),
        "fc1_b": 0.01 * jax.random.normal(ks[5], (120,), jnp.float32),
        "fc2_w": w(ks[6], (100, 120), 120),
        "fc2_b": 0.01 * jax.random.normal(ks[7], (100,), jnp.float32),
        "fc3_w": w(ks[8], (num_classes, 100), 100),
        "fc3_b": 0.01 * jax.random.normal(ks[9], (num_classes,), jnp.float32),
    }


def prepare_params(params):
    """Pre-transpose / pre-reshape / pre-cast weights once (perf feedback #2)."""
    def conv_w(w):   # [OC, C, KH, KW] -> [C*KH*KW, OC], bf16
        oc = w.shape[0]
        return jnp.transpose(w, (1, 2, 3, 0)).reshape(-1, oc).astype(jnp.bfloat16)

    def fc_w(w):     # torch [out, in] -> [in, out], bf16
        return jnp.transpose(w, (1, 0)).astype(jnp.bfloat16)

    def bias(v):     # [n] -> [1, n], f32 (accumulation dtype)
        return v.reshape(1, -1).astype(jnp.float32)

    return {
        "conv1_w": conv_w(params["conv1_w"]), "conv1_b": bias(params["conv1_b"]),
        "conv2_w": conv_w(params["conv2_w"]), "conv2_b": bias(params["conv2_b"]),
        "fc1_w": fc_w(params["fc1_w"]), "fc1_b": bias(params["fc1_b"]),
        "fc2_w": fc_w(params["fc2_w"]), "fc2_b": bias(params["fc2_b"]),
        "fc3_w": fc_w(params["fc3_w"]), "fc3_b": bias(params["fc3_b"]),
    }


# ----------------------------------------------------------------------------
# Full forward pass (matches CNN_FEMNIST.forward semantics).
# ----------------------------------------------------------------------------
def cnn_femnist_forward(prep, x_nchw):
    N = x_nchw.shape[0]
    x = jnp.transpose(x_nchw.astype(jnp.float32), (0, 2, 3, 1)).astype(jnp.bfloat16)  # NHWC

    # conv1 (1->4, 5x5) + ReLU, then 2x2 max pool
    p, OH, OW = im2col(x, 5, 5)                                             # [N*24*24, 25]
    y = matmul_bias_act(p, prep["conv1_w"], prep["conv1_b"], relu=True)     # [N*24*24, 4]
    y = maxpool2x2(y.reshape(N, OH, OW, 4))                                 # [N, 12, 12, 4]

    # conv2 (4->12, 5x5) + ReLU, then 2x2 max pool
    p, OH, OW = im2col(y, 5, 5)                                             # [N*8*8, 100]
    y = matmul_bias_act(p, prep["conv2_w"], prep["conv2_b"], relu=True)     # [N*8*8, 12]
    y = maxpool2x2(y.reshape(N, OH, OW, 12))                                # [N, 4, 4, 12]

    # torch x.view(-1, 12*4*4) flattens NCHW -> feature order (C, H, W)
    feat = jnp.transpose(y, (0, 3, 1, 2)).reshape(N, 12 * 4 * 4)

    # fc1+ReLU, fc2+ReLU, fc3, log_softmax: one fused Pallas kernel
    return mlp_head(feat, prep)


if __name__ == "__main__":
    key = jax.random.PRNGKey(0)
    k_params, k_x = jax.random.split(key)

    num_classes = 10            # args.num_classes in the reference module
    params = init_params(k_params, num_classes=num_classes)
    prep = prepare_params(params)   # one-time weight prep, outside the hot path

    batch = 2
    # fc1 = Linear(12*4*4, ...) forces the 1x28x28 FEMNIST input geometry.
    x = jax.random.normal(k_x, (batch, 1, 28, 28), jnp.float32)

    fwd = jax.jit(cnn_femnist_forward)
    out = jax.block_until_ready(fwd(prep, x))

    assert out.shape == (batch, num_classes), out.shape
    assert bool(jnp.all(jnp.isfinite(out)))
    # log_softmax rows (computed in f32 in-kernel) should exp-sum to 1
    assert bool(jnp.all(jnp.abs(jnp.sum(jnp.exp(out), axis=1) - 1.0) < 1e-3))
    print("KERNEL_OK")
</pallas_src>

<mosaic_0001>
module attributes {stable_mosaic.version = 11 : i64} {
  func.func @_matmul_bias_act_kernel(%arg0: i32, %arg1: memref<128x25xbf16, #tpu.memory_space<vmem>>, %arg2: memref<25x4xbf16, #tpu.memory_space<vmem>>, %arg3: memref<1x4xf32, #tpu.memory_space<vmem>>, %arg4: memref<128x4xbf16, #tpu.memory_space<vmem>>) attributes {dimension_semantics = [#tpu.dimension_semantics<parallel>], iteration_bounds = array<i64: 9>, scalar_prefetch = 0 : i64, scratch_operands = 0 : i64, tpu.core_type = #tpu.core_type<tc>, window_params = [{transform_indices = @transform_0, window_bounds = array<i64: 128, 25>}, {pipeline_mode = #tpu.pipeline_mode<synchronous>, transform_indices = @transform_1, window_bounds = array<i64: 25, 4>}, {pipeline_mode = #tpu.pipeline_mode<synchronous>, transform_indices = @transform_2, window_bounds = array<i64: 1, 4>}, {transform_indices = @transform_3, window_bounds = array<i64: 128, 4>}]} {
    %c0 = arith.constant 0 : index
    %c0_0 = arith.constant 0 : index
    %0 = vector.load %arg1[%c0, %c0_0] : memref<128x25xbf16, #tpu.memory_space<vmem>>, vector<128x25xbf16>
    %c0_1 = arith.constant 0 : index
    %c0_2 = arith.constant 0 : index
    %1 = vector.load %arg2[%c0_1, %c0_2] : memref<25x4xbf16, #tpu.memory_space<vmem>>, vector<25x4xbf16>
    %cst = arith.constant dense<0.000000e+00> : vector<128x4xf32>
    %2 = tpu.matmul %0, %1, %cst {dimension_numbers = #tpu.dot_dimension_numbers<[1], [0], [0], [1], [0, 0, 1, 1], [], []>} : vector<128x25xbf16>, vector<25x4xbf16>, vector<128x4xf32> -> vector<128x4xf32>
    %c0_3 = arith.constant 0 : index
    %c0_4 = arith.constant 0 : index
    %3 = vector.load %arg3[%c0_3, %c0_4] : memref<1x4xf32, #tpu.memory_space<vmem>>, vector<1x4xf32>
    %4 = vector.broadcast %3 : vector<1x4xf32> to vector<128x4xf32>
    %5 = arith.addf %2, %4 : vector<128x4xf32>
    %cst_5 = arith.constant 0.000000e+00 : f32
    %6 = vector.broadcast %cst_5 : f32 to vector<128x4xf32>
    %7 = arith.maximumf %5, %6 : vector<128x4xf32>
    %8 = arith.truncf %7 : vector<128x4xf32> to vector<128x4xbf16>
    %c0_6 = arith.constant 0 : index
    %c0_7 = arith.constant 0 : index
    %9 = vector.load %arg4[%c0_6, %c0_7] : memref<128x4xbf16, #tpu.memory_space<vmem>>, vector<128x4xbf16>
    tpu.vector_store %arg4[%c0_6, %c0_7], %8 {strides = array<i32>} : memref<128x4xbf16, #tpu.memory_space<vmem>>, vector<128x4xbf16>,
    return
  }
  func.func @transform_0(%arg0: i32) -> (i32, i32) {
    %c0_i32 = arith.constant 0 : i32
    %c0_i32_0 = arith.constant 0 : i32
    return %arg0, %c0_i32 : i32, i32
  }
  func.func @transform_1(%arg0: i32) -> (i32, i32) {
    %c0_i32 = arith.constant 0 : i32
    %c0_i32_0 = arith.constant 0 : i32
    %c0_i32_1 = arith.constant 0 : i32
    return %c0_i32, %c0_i32_0 : i32, i32
  }
  func.func @transform_2(%arg0: i32) -> (i32, i32) {
    %c0_i32 = arith.constant 0 : i32
    %c0_i32_0 = arith.constant 0 : i32
    %c0_i32_1 = arith.constant 0 : i32
    return %c0_i32, %c0_i32_0 : i32, i32
  }
  func.func @transform_3(%arg0: i32) -> (i32, i32) {
    %c0_i32 = arith.constant 0 : i32
    %c0_i32_0 = arith.constant 0 : i32
    return %arg0, %c0_i32 : i32, i32
  }
}

module attributes {stable_mosaic.version = 11 : i64} {
  func.func @_max4_kernel(%arg0: i32, %arg1: memref<288x4xbf16, #tpu.memory_space<vmem>>, %arg2: memref<288x4xbf16, #tpu.memory_space<vmem>>, %arg3: memref<288x4xbf16, #tpu.memory_space<vmem>>, %arg4: memref<288x4xbf16, #tpu.memory_space<vmem>>, %arg5: memref<288x4xbf16, #tpu.memory_space<vmem>>) attributes {dimension_semantics = [#tpu.dimension_semantics<arbitrary>], iteration_bounds = array<i64: 1>, scalar_prefetch = 0 : i64, scratch_operands = 0 : i64, tpu.core_type = #tpu.core_type<tc>, window_params = [{pipeline_mode = #tpu.pipeline_mode<synchronous>, transform_indices = @transform_0, window_bounds = array<i64: 288, 4>}, {pipeline_mode = #tpu.pipeline_mode<synchronous>, transform_indices = @transform_1, window_bounds = array<i64: 288, 4>}, {pipeline_mode = #tpu.pipeline_mode<synchronous>, transform_indices = @transform_2, window_bounds = array<i64: 288, 4>}, {pipeline_mode = #tpu.pipeline_mode<synchronous>, transform_indices = @transform_3, window_bounds = array<i64: 288, 4>}, {pipeline_mode = #tpu.pipeline_mode<synchronous>, transform_indices = @transform_4, window_bounds = array<i64: 288, 4>}]} {
    %c0 = arith.constant 0 : index
    %c0_0 = arith.constant 0 : index
    %0 = vector.load %arg1[%c0, %c0_0] : memref<288x4xbf16, #tpu.memory_space<vmem>>, vector<288x4xbf16>
    %c0_1 = arith.constant 0 : index
    %c0_2 = arith.constant 0 : index
    %1 = vector.load %arg2[%c0_1, %c0_2] : memref<288x4xbf16, #tpu.memory_space<vmem>>, vector<288x4xbf16>
    %2 = arith.maximumf %0, %1 : vector<288x4xbf16>
    %c0_3 = arith.constant 0 : index
    %c0_4 = arith.constant 0 : index
    %3 = vector.load %arg3[%c0_3, %c0_4] : memref<288x4xbf16, #tpu.memory_space<vmem>>, vector<288x4xbf16>
    %c0_5 = arith.constant 0 : index
    %c0_6 = arith.constant 0 : index
    %4 = vector.load %arg4[%c0_5, %c0_6] : memref<288x4xbf16, #tpu.memory_space<vmem>>, vector<288x4xbf16>
    %5 = arith.maximumf %3, %4 : vector<288x4xbf16>
    %6 = arith.maximumf %2, %5 : vector<288x4xbf16>
    %c0_7 = arith.constant 0 : index
    %c0_8 = arith.constant 0 : index
    %7 = vector.load %arg5[%c0_7, %c0_8] : memref<288x4xbf16, #tpu.memory_space<vmem>>, vector<288x4xbf16>
    tpu.vector_store %arg5[%c0_7, %c0_8], %6 {strides = array<i32>} : memref<288x4xbf16, #tpu.memory_space<vmem>>, vector<288x4xbf16>,
    return
  }
  func.func @transform_0(%arg0: i32) -> (i32, i32) {
    %c0_i32 = arith.constant 0 : i32
    %c0_i32_0 = arith.constant 0 : i32
    %c0_i32_1 = arith.constant 0 : i32
    return %c0_i32, %c0_i32_0 : i32, i32
  }
  func.func @transform_1(%arg0: i32) -> (i32, i32) {
    %c0_i32 = arith.constant 0 : i32
    %c0_i32_0 = arith.constant 0 : i32
    %c0_i32_1 = arith.constant 0 : i32
    return %c0_i32, %c0_i32_0 : i32, i32
  }
  func.func @transform_2(%arg0: i32) -> (i32, i32) {
    %c0_i32 = arith.constant 0 : i32
    %c0_i32_0 = arith.constant 0 : i32
    %c0_i32_1 = arith.constant 0 : i32
    return %c0_i32, %c0_i32_0 : i32, i32
  }
  func.func @transform_3(%arg0: i32) -> (i32, i32) {
    %c0_i32 = arith.constant 0 : i32
    %c0_i32_0 = arith.constant 0 : i32
    %c0_i32_1 = arith.constant 0 : i32
    return %c0_i32, %c0_i32_0 : i32, i32
  }
  func.func @transform_4(%arg0: i32) -> (i32, i32) {
    %c0_i32 = arith.constant 0 : i32
    %c0_i32_0 = arith.constant 0 : i32
    %c0_i32_1 = arith.constant 0 : i32
    return %c0_i32, %c0_i32_0 : i32, i32
  }
}

module attributes {stable_mosaic.version = 11 : i64} {
  func.func @_matmul_bias_act_kernel(%arg0: i32, %arg1: memref<128x100xbf16, #tpu.memory_space<vmem>>, %arg2: memref<100x12xbf16, #tpu.memory_space<vmem>>, %arg3: memref<1x12xf32, #tpu.memory_space<vmem>>, %arg4: memref<128x12xbf16, #tpu.memory_space<vmem>>) attributes {dimension_semantics = [#tpu.dimension_semantics<parallel>], iteration_bounds = array<i64: 1>, scalar_prefetch = 0 : i64, scratch_operands = 0 : i64, tpu.core_type = #tpu.core_type<tc>, window_params = [{transform_indices = @transform_0, window_bounds = array<i64: 128, 100>}, {pipeline_mode = #tpu.pipeline_mode<synchronous>, transform_indices = @transform_1, window_bounds = array<i64: 100, 12>}, {pipeline_mode = #tpu.pipeline_mode<synchronous>, transform_indices = @transform_2, window_bounds = array<i64: 1, 12>}, {transform_indices = @transform_3, window_bounds = array<i64: 128, 12>}]} {
    %c0 = arith.constant 0 : index
    %c0_0 = arith.constant 0 : index
    %0 = vector.load %arg1[%c0, %c0_0] : memref<128x100xbf16, #tpu.memory_space<vmem>>, vector<128x100xbf16>
    %c0_1 = arith.constant 0 : index
    %c0_2 = arith.constant 0 : index
    %1 = vector.load %arg2[%c0_1, %c0_2] : memref<100x12xbf16, #tpu.memory_space<vmem>>, vector<100x12xbf16>
    %cst = arith.constant dense<0.000000e+00> : vector<128x12xf32>
    %2 = tpu.matmul %0, %1, %cst {dimension_numbers = #tpu.dot_dimension_numbers<[1], [0], [0], [1], [0, 0, 1, 1], [], []>} : vector<128x100xbf16>, vector<100x12xbf16>, vector<128x12xf32> -> vector<128x12xf32>
    %c0_3 = arith.constant 0 : index
    %c0_4 = arith.constant 0 : index
    %3 = vector.load %arg3[%c0_3, %c0_4] : memref<1x12xf32, #tpu.memory_space<vmem>>, vector<1x12xf32>
    %4 = vector.broadcast %3 : vector<1x12xf32> to vector<128x12xf32>
    %5 = arith.addf %2, %4 : vector<128x12xf32>
    %cst_5 = arith.constant 0.000000e+00 : f32
    %6 = vector.broadcast %cst_5 : f32 to vector<128x12xf32>
    %7 = arith.maximumf %5, %6 : vector<128x12xf32>
    %8 = arith.truncf %7 : vector<128x12xf32> to vector<128x12xbf16>
    %c0_6 = arith.constant 0 : index
    %c0_7 = arith.constant 0 : index
    %9 = vector.load %arg4[%c0_6, %c0_7] : memref<128x12xbf16, #tpu.memory_space<vmem>>, vector<128x12xbf16>
    tpu.vector_store %arg4[%c0_6, %c0_7], %8 {strides = array<i32>} : memref<128x12xbf16, #tpu.memory_space<vmem>>, vector<128x12xbf16>,
    return
  }
  func.func @transform_0(%arg0: i32) -> (i32, i32) {
    %c0_i32 = arith.constant 0 : i32
    %c0_i32_0 = arith.constant 0 : i32
    return %arg0, %c0_i32 : i32, i32
  }
  func.func @transform_1(%arg0: i32) -> (i32, i32) {
    %c0_i32 = arith.constant 0 : i32
    %c0_i32_0 = arith.constant 0 : i32
    %c0_i32_1 = arith.constant 0 : i32
    return %c0_i32, %c0_i32_0 : i32, i32
  }
  func.func @transform_2(%arg0: i32) -> (i32, i32) {
    %c0_i32 = arith.constant 0 : i32
    %c0_i32_0 = arith.constant 0 : i32
    %c0_i32_1 = arith.constant 0 : i32
    return %c0_i32, %c0_i32_0 : i32, i32
  }
  func.func @transform_3(%arg0: i32) -> (i32, i32) {
    %c0_i32 = arith.constant 0 : i32
    %c0_i32_0 = arith.constant 0 : i32
    return %arg0, %c0_i32 : i32, i32
  }
}

module attributes {stable_mosaic.version = 11 : i64} {
  func.func @_max4_kernel(%arg0: i32, %arg1: memref<32x12xbf16, #tpu.memory_space<vmem>>, %arg2: memref<32x12xbf16, #tpu.memory_space<vmem>>, %arg3: memref<32x12xbf16, #tpu.memory_space<vmem>>, %arg4: memref<32x12xbf16, #tpu.memory_space<vmem>>, %arg5: memref<32x12xbf16, #tpu.memory_space<vmem>>) attributes {dimension_semantics = [#tpu.dimension_semantics<arbitrary>], iteration_bounds = array<i64: 1>, scalar_prefetch = 0 : i64, scratch_operands = 0 : i64, tpu.core_type = #tpu.core_type<tc>, window_params = [{pipeline_mode = #tpu.pipeline_mode<synchronous>, transform_indices = @transform_0, window_bounds = array<i64: 32, 12>}, {pipeline_mode = #tpu.pipeline_mode<synchronous>, transform_indices = @transform_1, window_bounds = array<i64: 32, 12>}, {pipeline_mode = #tpu.pipeline_mode<synchronous>, transform_indices = @transform_2, window_bounds = array<i64: 32, 12>}, {pipeline_mode = #tpu.pipeline_mode<synchronous>, transform_indices = @transform_3, window_bounds = array<i64: 32, 12>}, {pipeline_mode = #tpu.pipeline_mode<synchronous>, transform_indices = @transform_4, window_bounds = array<i64: 32, 12>}]} {
    %c0 = arith.constant 0 : index
    %c0_0 = arith.constant 0 : index
    %0 = vector.load %arg1[%c0, %c0_0] : memref<32x12xbf16, #tpu.memory_space<vmem>>, vector<32x12xbf16>
    %c0_1 = arith.constant 0 : index
    %c0_2 = arith.constant 0 : index
    %1 = vector.load %arg2[%c0_1, %c0_2] : memref<32x12xbf16, #tpu.memory_space<vmem>>, vector<32x12xbf16>
    %2 = arith.maximumf %0, %1 : vector<32x12xbf16>
    %c0_3 = arith.constant 0 : index
    %c0_4 = arith.constant 0 : index
    %3 = vector.load %arg3[%c0_3, %c0_4] : memref<32x12xbf16, #tpu.memory_space<vmem>>, vector<32x12xbf16>
    %c0_5 = arith.constant 0 : index
    %c0_6 = arith.constant 0 : index
    %4 = vector.load %arg4[%c0_5, %c0_6] : memref<32x12xbf16, #tpu.memory_space<vmem>>, vector<32x12xbf16>
    %5 = arith.maximumf %3, %4 : vector<32x12xbf16>
    %6 = arith.maximumf %2, %5 : vector<32x12xbf16>
    %c0_7 = arith.constant 0 : index
    %c0_8 = arith.constant 0 : index
    %7 = vector.load %arg5[%c0_7, %c0_8] : memref<32x12xbf16, #tpu.memory_space<vmem>>, vector<32x12xbf16>
    tpu.vector_store %arg5[%c0_7, %c0_8], %6 {strides = array<i32>} : memref<32x12xbf16, #tpu.memory_space<vmem>>, vector<32x12xbf16>,
    return
  }
  func.func @transform_0(%arg0: i32) -> (i32, i32) {
    %c0_i32 = arith.constant 0 : i32
    %c0_i32_0 = arith.constant 0 : i32
    %c0_i32_1 = arith.constant 0 : i32
    return %c0_i32, %c0_i32_0 : i32, i32
  }
  func.func @transform_1(%arg0: i32) -> (i32, i32) {
    %c0_i32 = arith.constant 0 : i32
    %c0_i32_0 = arith.constant 0 : i32
    %c0_i32_1 = arith.constant 0 : i32
    return %c0_i32, %c0_i32_0 : i32, i32
  }
  func.func @transform_2(%arg0: i32) -> (i32, i32) {
    %c0_i32 = arith.constant 0 : i32
    %c0_i32_0 = arith.constant 0 : i32
    %c0_i32_1 = arith.constant 0 : i32
    return %c0_i32, %c0_i32_0 : i32, i32
  }
  func.func @transform_3(%arg0: i32) -> (i32, i32) {
    %c0_i32 = arith.constant 0 : i32
    %c0_i32_0 = arith.constant 0 : i32
    %c0_i32_1 = arith.constant 0 : i32
    return %c0_i32, %c0_i32_0 : i32, i32
  }
  func.func @transform_4(%arg0: i32) -> (i32, i32) {
    %c0_i32 = arith.constant 0 : i32
    %c0_i32_0 = arith.constant 0 : i32
    %c0_i32_1 = arith.constant 0 : i32
    return %c0_i32, %c0_i32_0 : i32, i32
  }
}

module attributes {stable_mosaic.version = 11 : i64} {
  func.func @_mlp_head_kernel(%arg0: i32, %arg1: memref<2x192xbf16, #tpu.memory_space<vmem>>, %arg2: memref<192x120xbf16, #tpu.memory_space<vmem>>, %arg3: memref<1x120xf32, #tpu.memory_space<vmem>>, %arg4: memref<120x100xbf16, #tpu.memory_space<vmem>>, %arg5: memref<1x100xf32, #tpu.memory_space<vmem>>, %arg6: memref<100x10xbf16, #tpu.memory_space<vmem>>, %arg7: memref<1x10xf32, #tpu.memory_space<vmem>>, %arg8: memref<2x10xf32, #tpu.memory_space<vmem>>) attributes {dimension_semantics = [#tpu.dimension_semantics<arbitrary>], iteration_bounds = array<i64: 1>, scalar_prefetch = 0 : i64, scratch_operands = 0 : i64, tpu.core_type = #tpu.core_type<tc>, window_params = [{pipeline_mode = #tpu.pipeline_mode<synchronous>, transform_indices = @transform_0, window_bounds = array<i64: 2, 192>}, {pipeline_mode = #tpu.pipeline_mode<synchronous>, transform_indices = @transform_1, window_bounds = array<i64: 192, 120>}, {pipeline_mode = #tpu.pipeline_mode<synchronous>, transform_indices = @transform_2, window_bounds = array<i64: 1, 120>}, {pipeline_mode = #tpu.pipeline_mode<synchronous>, transform_indices = @transform_3, window_bounds = array<i64: 120, 100>}, {pipeline_mode = #tpu.pipeline_mode<synchronous>, transform_indices = @transform_4, window_bounds = array<i64: 1, 100>}, {pipeline_mode = #tpu.pipeline_mode<synchronous>, transform_indices = @transform_5, window_bounds = array<i64: 100, 10>}, {pipeline_mode = #tpu.pipeline_mode<synchronous>, transform_indices = @transform_6, window_bounds = array<i64: 1, 10>}, {pipeline_mode = #tpu.pipeline_mode<synchronous>, transform_indices = @transform_7, window_bounds = array<i64: 2, 10>}]} {
    %c0 = arith.constant 0 : index
    %c0_0 = arith.constant 0 : index
    %0 = vector.load %arg1[%c0, %c0_0] : memref<2x192xbf16, #tpu.memory_space<vmem>>, vector<2x192xbf16>
    %c0_1 = arith.constant 0 : index
    %c0_2 = arith.constant 0 : index
    %1 = vector.load %arg2[%c0_1, %c0_2] : memref<192x120xbf16, #tpu.memory_space<vmem>>, vector<192x120xbf16>
    %cst = arith.constant dense<0.000000e+00> : vector<2x120xf32>
    %2 = tpu.matmul %0, %1, %cst {dimension_numbers = #tpu.dot_dimension_numbers<[1], [0], [0], [1], [0, 0, 1, 1], [], []>} : vector<2x192xbf16>, vector<192x120xbf16>, vector<2x120xf32> -> vector<2x120xf32>
    %c0_3 = arith.constant 0 : index
    %c0_4 = arith.constant 0 : index
    %3 = vector.load %arg3[%c0_3, %c0_4] : memref<1x120xf32, #tpu.memory_space<vmem>>, vector<1x120xf32>
    %4 = vector.broadcast %3 : vector<1x120xf32> to vector<2x120xf32>
    %5 = arith.addf %2, %4 : vector<2x120xf32>
    %cst_5 = arith.constant 0.000000e+00 : f32
    %6 = vector.broadcast %cst_5 : f32 to vector<2x120xf32>
    %7 = arith.maximumf %5, %6 : vector<2x120xf32>
    %8 = arith.truncf %7 : vector<2x120xf32> to vector<2x120xbf16>
    %c0_6 = arith.constant 0 : index
    %c0_7 = arith.constant 0 : index
    %9 = vector.load %arg4[%c0_6, %c0_7] : memref<120x100xbf16, #tpu.memory_space<vmem>>, vector<120x100xbf16>
    %cst_8 = arith.constant dense<0.000000e+00> : vector<2x100xf32>
    %10 = tpu.matmul %8, %9, %cst_8 {dimension_numbers = #tpu.dot_dimension_numbers<[1], [0], [0], [1], [0, 0, 1, 1], [], []>} : vector<2x120xbf16>, vector<120x100xbf16>, vector<2x100xf32> -> vector<2x100xf32>
    %c0_9 = arith.constant 0 : index
    %c0_10 = arith.constant 0 : index
    %11 = vector.load %arg5[%c0_9, %c0_10] : memref<1x100xf32, #tpu.memory_space<vmem>>, vector<1x100xf32>
    %12 = vector.broadcast %11 : vector<1x100xf32> to vector<2x100xf32>
    %13 = arith.addf %10, %12 : vector<2x100xf32>
    %cst_11 = arith.constant 0.000000e+00 : f32
    %14 = vector.broadcast %cst_11 : f32 to vector<2x100xf32>
    %15 = arith.maximumf %13, %14 : vector<2x100xf32>
    %16 = arith.truncf %15 : vector<2x100xf32> to vector<2x100xbf16>
    %c0_12 = arith.constant 0 : index
    %c0_13 = arith.constant 0 : index
    %17 = vector.load %arg6[%c0_12, %c0_13] : memref<100x10xbf16, #tpu.memory_space<vmem>>, vector<100x10xbf16>
    %cst_14 = arith.constant dense<0.000000e+00> : vector<2x10xf32>
    %18 = tpu.matmul %16, %17, %cst_14 {dimension_numbers = #tpu.dot_dimension_numbers<[1], [0], [0], [1], [0, 0, 1, 1], [], []>} : vector<2x100xbf16>, vector<100x10xbf16>, vector<2x10xf32> -> vector<2x10xf32>
    %c0_15 = arith.constant 0 : index
    %c0_16 = arith.constant 0 : index
    %19 = vector.load %arg7[%c0_15, %c0_16] : memref<1x10xf32, #tpu.memory_space<vmem>>, vector<1x10xf32>
    %20 = vector.broadcast %19 : vector<1x10xf32> to vector<2x10xf32>
    %21 = arith.addf %18, %20 : vector<2x10xf32>
    %cst_17 = arith.constant dense<0xFF800000> : vector<2xf32>
    %22 = vector.multi_reduction <maximumf>, %21, %cst_17 [1] : vector<2x10xf32> to vector<2xf32>
    %23 = vector.shape_cast %22 : vector<2xf32> to vector<2x1xf32>
    %24 = vector.broadcast %23 : vector<2x1xf32> to vector<2x10xf32>
    %25 = arith.subf %21, %24 : vector<2x10xf32>
    %26 = math.exp %25 : vector<2x10xf32>
    %cst_18 = arith.constant dense<0.000000e+00> : vector<2xf32>
    %27 = vector.multi_reduction <add>, %26, %cst_18 [1] : vector<2x10xf32> to vector<2xf32>
    %28 = vector.shape_cast %27 : vector<2xf32> to vector<2x1xf32>
    %29 = math.log %28 : vector<2x1xf32>
    %30 = arith.addf %29, %23 : vector<2x1xf32>
    %31 = vector.broadcast %30 : vector<2x1xf32> to vector<2x10xf32>
    %32 = arith.subf %21, %31 : vector<2x10xf32>
    %c0_19 = arith.constant 0 : index
    %c0_20 = arith.constant 0 : index
    %33 = vector.load %arg8[%c0_19, %c0_20] : memref<2x10xf32, #tpu.memory_space<vmem>>, vector<2x10xf32>
    tpu.vector_store %arg8[%c0_19, %c0_20], %32 {strides = array<i32>} : memref<2x10xf32, #tpu.memory_space<vmem>>, vector<2x10xf32>,
    return
  }
  func.func @transform_0(%arg0: i32) -> (i32, i32) {
    %c0_i32 = arith.constant 0 : i32
    %c0_i32_0 = arith.constant 0 : i32
    %c0_i32_1 = arith.constant 0 : i32
    return %c0_i32, %c0_i32_0 : i32, i32
  }
  func.func @transform_1(%arg0: i32) -> (i32, i32) {
    %c0_i32 = arith.constant 0 : i32
    %c0_i32_0 = arith.constant 0 : i32
    %c0_i32_1 = arith.constant 0 : i32
    return %c0_i32, %c0_i32_0 : i32, i32
  }
  func.func @transform_2(%arg0: i32) -> (i32, i32) {
    %c0_i32 = arith.constant 0 : i32
    %c0_i32_0 = arith.constant 0 : i32
    %c0_i32_1 = arith.constant 0 : i32
    return %c0_i32, %c0_i32_0 : i32, i32
  }
  func.func @transform_3(%arg0: i32) -> (i32, i32) {
    %c0_i32 = arith.constant 0 : i32
    %c0_i32_0 = arith.constant 0 : i32
    %c0_i32_1 = arith.constant 0 : i32
    return %c0_i32, %c0_i32_0 : i32, i32
  }
  func.func @transform_4(%arg0: i32) -> (i32, i32) {
    %c0_i32 = arith.constant 0 : i32
    %c0_i32_0 = arith.constant 0 : i32
    %c0_i32_1 = arith.constant 0 : i32
    return %c0_i32, %c0_i32_0 : i32, i32
  }
  func.func @transform_5(%arg0: i32) -> (i32, i32) {
    %c0_i32 = arith.constant 0 : i32
    %c0_i32_0 = arith.constant 0 : i32
    %c0_i32_1 = arith.constant 0 : i32
    return %c0_i32, %c0_i32_0 : i32, i32
  }
  func.func @transform_6(%arg0: i32) -> (i32, i32) {
    %c0_i32 = arith.constant 0 : i32
    %c0_i32_0 = arith.constant 0 : i32
    %c0_i32_1 = arith.constant 0 : i32
    return %c0_i32, %c0_i32_0 : i32, i32
  }
  func.func @transform_7(%arg0: i32) -> (i32, i32) {
    %c0_i32 = arith.constant 0 : i32
    %c0_i32_0 = arith.constant 0 : i32
    %c0_i32_1 = arith.constant 0 : i32
    return %c0_i32, %c0_i32_0 : i32, i32
  }
}

</mosaic_0001>

<bundles_post_ra>
// kernel: cnn_femnist_forward.5
= control target key start
LH: loop header
LB: loop body
LE: loop exit
PB: predicated region body
PF: predicated region fallthrough
CT: control target
= control target key end

     0   :  { %s679_s12 = smov 0   ;;  %s772_s0 = inlined_call_operand.vmem [shape: bf16[1152,25], index: 0, kind: input, shape index: {}]   ;;  %s773_s1 = inlined_call_operand.vmem [shape: bf16[25,4], index: 1, kind: input, shape index: {}]   ;;  %s774_s2 = inlined_call_operand.vmem [shape: f32[1,4], index: 2, kind: input, shape index: {}]   ;;  %s775_s3 = inlined_call_operand.vmem [shape: bf16[1152,4], index: 3, kind: output, shape index: {}]  }
   0x1 LB: > { %s535_s13 = sadd.s32 4294967295, %s656_s12   ;;  %p539_p0 = scmp.ge.s32.totalorder %s656_s12, 1  ;;  %s656_s12 = sphi %s679_s12, %s13_s12  }
   0x2   : > { %p138_p1 = scmp.lt.s32.totalorder %s656_s12, 10 }
   0x4   : > { %p139_p2 = pnand %p539_p0, %p138_p1 }
   0x5   : > { %v640_v0 = vld [vmem:[%s773_s1] sm:$0xff] (!%p139_p2)   ;;  %vm278_vm0 = vcmask (!%p139_p2), 1043456   ;;  %v641_v1 = vld [vmem:[%s773_s1 + $0x8] sm:$0x1f] (!%p139_p2)   ;;  %vm279_vm1 = vcmask (!%p139_p2), 1044480   ;;  %s540_s18 = sshll.u32 (!%p139_p2), %s535_s13, 4 }
   0x6   : > { %142 = sbr.rel (%p139_p2) target bundleno = 249 (0xf9), region = 32  ;;  %607 = vmatprep.subr.bf16.mxu0 (!%p139_p2), %v640_v0  ;;  %627 = vmatprep.subr.bf16.mxu1 (!%p139_p2), %v640_v0  ;;  %v658_v2 = vmov (!%p139_p2), 65535   ;;  %p163_p3 = scmp.lt.s32.totalorder (!%p139_p2), %s540_s18, 143  ;;  %vm253_vm2 = vcmask (!%p139_p2), 203776   ;;  %v712_v14 = vld [vmem:[%s774_s2] ss:$0 sm:$0xff] (!%p139_p2) }
   0x7   : > { %608 = vmatpush3.bf16.msra.mxu0 (!%p139_p2), %v640_v0  ;;  %629 = vmatpush3.bf16.msra.mxu1 (!%p139_p2), %v640_v0  ;;  %v280_v3 = vsel (!%p139_p2), %vm278_vm0, 4294967295, %v658_v2  ;;  %vm462_vm3 = vcmask (!%p139_p2), 27648  }
   0x8   : > { %v281_v4 = vsel (!%p139_p2), %vm279_vm1, %v280_v3, 0 }
   0x9   : > { %v283_v5 = vand.u32 (!%p139_p2), %v641_v1, %v281_v4 }
   0xb   : > { %609 = vmatprep.subr.bf16.mxu0 (!%p139_p2), %v283_v5  ;;  %628 = vmatprep.subr.bf16.mxu1 (!%p139_p2), %v283_v5 }
   0xc   : > { %610 = vmatpush3.bf16.msra.mxu0 (!%p139_p2), %v283_v5  ;;  %630 = vmatpush3.bf16.msra.mxu1 (!%p139_p2), %v283_v5 }
   0xd   : > { %s777_s18 = smov (!%p163_p3, %s540_s18), 143 }
   0xe   : > { %s541_s19 = sshll.u32 %s777_s18, 2 }
   0xf   : > { %s166_s22 = scalar_lea.vmem %s772_s0, %s541_s19  ;;  %s724_s27 = scalar_lea.vmem %s775_s3, %s541_s19 }
  0x10   : > { %v642_v6 = vld [vmem:[%s166_s22] sm:$0xff]   ;;  %v644_v8 = vld [vmem:[%s166_s22 + $0x8] sm:$0xff]   ;;  %v646_v10 = vld [vmem:[%s166_s22 + $0x10] sm:$0xff]  }
  0x11   : > { %v643_v7 = vld [vmem:[%s166_s22 + $0x20] sm:$0xff]   ;;  %611 = vmatprep.mubr.msk.bf16.mxu0 %vm253_vm2, %v642_v6  ;;  %v645_v9 = vld [vmem:[%s166_s22 + $0x28] sm:$0xff]   ;;  %v647_v11 = vld [vmem:[%s166_s22 + $0x30] sm:$0xff]  }
  0x12   : > { %619 = vmatprep.mubr.msk.bf16.mxu1 %vm253_vm2, %v643_v7  ;;  %612 = vmatmul.mubr.msk.bf16.vlgmr.msra.gmra.mrb[0].mxu0 %vm253_vm2, %v644_v8  ;;  %v648_v12 = vld [vmem:[%s166_s22 + $0x18] sm:$0xff]  }
  0x13   : > { %620 = vmatmul.mubr.msk.bf16.vlgmr.msra.gmra.mrb[0].mxu1 %vm253_vm2, %v645_v9  ;;  %615 = vmatprep.mubr.msk.bf16.mxu0 %vm253_vm2, %v646_v10  ;;  %v649_v13 = vld [vmem:[%s166_s22 + $0x38] sm:$0xff]  }
  0x14   : > { %623 = vmatprep.mubr.msk.bf16.mxu1 %vm253_vm2, %v647_v11 }
  0x1a   : > { %616 = vmatmul.mubr.msk.bf16.gmra.mrb[4].mxu0 %vm253_vm2, %v648_v12 }
  0x1b   : > { %624 = vmatmul.mubr.msk.bf16.gmra.mrb[4].mxu1 %vm253_vm2, %v649_v13 }
  0xe5   : > { %v613_v15 = vpop.f32.mrb[0].mxu0 }
  0xe6   : > { %v328_v16 = vadd.f32 %v613_v15, %v712_v14  ;;  %v621_v17 = vpop.f32.mrb[0].mxu1  ;;  %v319_v18 = vpop.f32.mrb[1].mxu0 }
  0xe7   : > { %v360_v19 = vadd.f32 %v621_v17, %v712_v14  ;;  %v320_v20 = vadd.f32 %v712_v14, %v319_v18  ;;  %v351_v21 = vpop.f32.mrb[1].mxu1  ;;  %v614_v22 = vpop.f32.mrb[2].mxu0 }
  0xe8   : > { %v384_v23 = vmax.f32 %v328_v16, 0.0  ;;  %v352_v24 = vadd.f32 %v712_v14, %v351_v21  ;;  %v331_v25 = vadd.f32 %v614_v22, %v712_v14  ;;  %v622_v26 = vpop.f32.mrb[2].mxu1  ;;  %v322_v27 = vpop.f32.mrb[3].mxu0 }
  0xe9   : > { %v392_v28 = vmax.f32 %v360_v19, 0.0  ;;  %v382_v29 = vmax.f32 %v320_v20, 0.0  ;;  %v363_v30 = vadd.f32 %v622_v26, %v712_v14  ;;  %v323_v31 = vadd.f32 %v712_v14, %v322_v27  ;;  %v354_v32 = vpop.f32.mrb[3].mxu1 }
  0xea   : > { %v583_v33 = vpack.c.bf16 %v384_v23, %v384_v23  ;;  %v390_v34 = vmax.f32 %v352_v24, 0.0  ;;  %v385_v35 = vmax.f32 %v331_v25, 0.0  ;;  %v355_v36 = vadd.f32 %v712_v14, %v354_v32 }
  0xeb   : > { %v591_v37 = vpack.c.bf16 %v392_v28, %v392_v28  ;;  %v581_v38 = vpack.c.bf16 %v382_v29, %v382_v29  ;;  %v393_v39 = vmax.f32 %v363_v30, 0.0  ;;  %v383_v40 = vmax.f32 %v323_v31, 0.0 }
  0xec   : > { %465 = vst.msk [vmem:[%s724_s27 + $0x8] sm:$0xf] %vm462_vm3, %v583_v33  ;;  %v589_v41 = vpack.c.bf16 %v390_v34, %v390_v34  ;;  %v584_v42 = vpack.c.bf16 %v385_v35, %v385_v35  ;;  %v391_v43 = vmax.f32 %v355_v36, 0.0 }
  0xed   : > { %473 = vst.msk [vmem:[%s724_s27 + $0x28] sm:$0xf] %vm462_vm3, %v591_v37  ;;  %463 = vst.msk [vmem:[%s724_s27] sm:$0xf] %vm462_vm3, %v581_v38  ;;  %v592_v44 = vpack.c.bf16 %v393_v39, %v393_v39  ;;  %v582_v45 = vpack.c.bf16 %v383_v40, %v383_v40  ;;  %v617_v46 = vpop.f32.mrb[4].mxu0 }
  0xee   : > { %471 = vst.msk [vmem:[%s724_s27 + $0x20] sm:$0xf] %vm462_vm3, %v589_v41  ;;  %466 = vst.msk [vmem:[%s724_s27 + $0xc] sm:$0xf] %vm462_vm3, %v584_v42  ;;  %v590_v47 = vpack.c.bf16 %v391_v43, %v391_v43  ;;  %v344_v48 = vadd.f32 %v617_v46, %v712_v14  ;;  %v625_v49 = vpop.f32.mrb[4].mxu1  ;;  %v335_v50 = vpop.f32.mrb[5].mxu0 }
  0xef   : > { %474 = vst.msk [vmem:[%s724_s27 + $0x2c] sm:$0xf] %vm462_vm3, %v592_v44  ;;  %464 = vst.msk [vmem:[%s724_s27 + $0x4] sm:$0xf] %vm462_vm3, %v582_v45  ;;  %v376_v51 = vadd.f32 %v625_v49, %v712_v14  ;;  %v336_v52 = vadd.f32 %v712_v14, %v335_v50  ;;  %v367_v53 = vpop.f32.mrb[5].mxu1  ;;  %v618_v54 = vpop.f32.mrb[6].mxu0 }
  0xf0   : > { %472 = vst.msk [vmem:[%s724_s27 + $0x24] sm:$0xf] %vm462_vm3, %v590_v47  ;;  %v388_v55 = vmax.f32 %v344_v48, 0.0  ;;  %v368_v56 = vadd.f32 %v712_v14, %v367_v53  ;;  %v347_v57 = vadd.f32 %v618_v54, %v712_v14  ;;  %v626_v58 = vpop.f32.mrb[6].mxu1  ;;  %v338_v59 = vpop.f32.mrb[7].mxu0 }
  0xf1   : > { %v396_v60 = vmax.f32 %v376_v51, 0.0  ;;  %v386_v61 = vmax.f32 %v336_v52, 0.0  ;;  %v379_v62 = vadd.f32 %v626_v58, %v712_v14  ;;  %v339_v63 = vadd.f32 %v712_v14, %v338_v59  ;;  %v370_v0 = vpop.f32.mrb[7].mxu1 }
  0xf2   : > { %v587_v1 = vpack.c.bf16 %v388_v55, %v388_v55  ;;  %v394_v2 = vmax.f32 %v368_v56, 0.0  ;;  %v389_v3 = vmax.f32 %v347_v57, 0.0  ;;  %v371_v4 = vadd.f32 %v712_v14, %v370_v0 }
  0xf3   : > { %v595_v5 = vpack.c.bf16 %v396_v60, %v396_v60  ;;  %v585_v6 = vpack.c.bf16 %v386_v61, %v386_v61  ;;  %v397_v7 = vmax.f32 %v379_v62, 0.0  ;;  %v387_v8 = vmax.f32 %v339_v63, 0.0 }
  0xf4   : > { %469 = vst.msk [vmem:[%s724_s27 + $0x18] sm:$0xf] %vm462_vm3, %v587_v1  ;;  %v593_v9 = vpack.c.bf16 %v394_v2, %v394_v2  ;;  %v588_v10 = vpack.c.bf16 %v389_v3, %v389_v3  ;;  %v395_v11 = vmax.f32 %v371_v4, 0.0 }
  0xf5   : > { %477 = vst.msk [vmem:[%s724_s27 + $0x38] sm:$0xf] %vm462_vm3, %v595_v5  ;;  %467 = vst.msk [vmem:[%s724_s27 + $0x10] sm:$0xf] %vm462_vm3, %v585_v6  ;;  %v596_v12 = vpack.c.bf16 %v397_v7, %v397_v7  ;;  %v586_v13 = vpack.c.bf16 %v387_v8, %v387_v8 }
  0xf6   : > { %475 = vst.msk [vmem:[%s724_s27 + $0x30] sm:$0xf] %vm462_vm3, %v593_v9  ;;  %470 = vst.msk [vmem:[%s724_s27 + $0x1c] sm:$0xf] %vm462_vm3, %v588_v10  ;;  %v594_v14 = vpack.c.bf16 %v395_v11, %v395_v11 }
  0xf7   : > { %478 = vst.msk [vmem:[%s724_s27 + $0x3c] sm:$0xf] %vm462_vm3, %v596_v12  ;;  %468 = vst.msk [vmem:[%s724_s27 + $0x14] sm:$0xf] %vm462_vm3, %v586_v13 }
  0xf8   : > { %476 = vst.msk [vmem:[%s724_s27 + $0x34] sm:$0xf] %vm462_vm3, %v594_v14 }
  0xf9 PF: > { %s13_s12 = sadd.s32 1, %s656_s12  }
  0xfa   : > { %p10_p4 = scmp.ge.s32.totalorder %s13_s12, 11  }
  0xfc   :  { %12 = sbr.rel (!%p10_p4) target bundleno = 1 (0x1), region = 62 }

// kernel: cnn_femnist_forward.6
= control target key start
LH: loop header
LB: loop body
LE: loop exit
PB: predicated region body
PF: predicated region fallthrough
CT: control target
= control target key end

     0   :  { %vm269_vm0 = vcmask 27648   ;;  %s911_s0 = inlined_call_operand.vmem [shape: bf16[288,4], index: 0, kind: input, shape index: {}]   ;;  %s912_s1 = inlined_call_operand.vmem [shape: bf16[288,4], index: 1, kind: input, shape index: {}]   ;;  %s913_s2 = inlined_call_operand.vmem [shape: bf16[288,4], index: 2, kind: input, shape index: {}]   ;;  %s914_s3 = inlined_call_operand.vmem [shape: bf16[288,4], index: 3, kind: input, shape index: {}]   ;;  %s915_s4 = inlined_call_operand.vmem [shape: bf16[288,4], index: 4, kind: output, shape index: {}]  }
   0x1   :  { %v17_v0 = vld [vmem:[%s911_s0] sm:$0xf]  ;;  %v18_v5 = vld [vmem:[%s911_s0 + $0x4] sm:$0xf]  ;;  %v19_v11 = vld [vmem:[%s911_s0 + $0x8] sm:$0xf] }
   0x2   :  { %v53_v1 = vld [vmem:[%s912_s1] sm:$0xf]  ;;  %v54_v6 = vld [vmem:[%s912_s1 + $0x4] sm:$0xf]  ;;  %v55_v13 = vld [vmem:[%s912_s1 + $0x8] sm:$0xf] }
   0x3   :  { %v125_v2 = vld [vmem:[%s913_s2] sm:$0xf]  ;;  %v89_v3 = vmax.bf16 %v53_v1, %v17_v0  ;;  %v90_v8 = vmax.bf16 %v54_v6, %v18_v5  ;;  %v126_v9 = vld [vmem:[%s913_s2 + $0x4] sm:$0xf]  ;;  %v127_v14 = vld [vmem:[%s913_s2 + $0x8] sm:$0xf]  ;;  %v91_v17 = vmax.bf16 %v55_v13, %v19_v11 }
   0x4   :  { %v161_v4 = vld [vmem:[%s914_s3] sm:$0xf]  ;;  %v162_v10 = vld [vmem:[%s914_s3 + $0x4] sm:$0xf]  ;;  %v163_v15 = vld [vmem:[%s914_s3 + $0x8] sm:$0xf] }
   0x5   :  { %v197_v7 = vmax.bf16 %v161_v4, %v125_v2  ;;  %v198_v12 = vmax.bf16 %v162_v10, %v126_v9  ;;  %v199_v18 = vmax.bf16 %v163_v15, %v127_v14  ;;  %v20_v19 = vld [vmem:[%s911_s0 + $0xc] sm:$0xf]  ;;  %v21_v25 = vld [vmem:[%s911_s0 + $0x10] sm:$0xf]  ;;  %v22_v32 = vld [vmem:[%s911_s0 + $0x14] sm:$0xf] }
   0x6   :  { %v56_v20 = vld [vmem:[%s912_s1 + $0xc] sm:$0xf]  ;;  %v57_v26 = vld [vmem:[%s912_s1 + $0x10] sm:$0xf]  ;;  %v58_v34 = vld [vmem:[%s912_s1 + $0x14] sm:$0xf] }
   0x7   :  { %v233_v16 = vmax.bf16 %v197_v7, %v89_v3  ;;  %v128_v21 = vld [vmem:[%s913_s2 + $0xc] sm:$0xf]  ;;  %v234_v22 = vmax.bf16 %v198_v12, %v90_v8  ;;  %v92_v23 = vmax.bf16 %v56_v20, %v20_v19  ;;  %v235_v27 = vmax.bf16 %v199_v18, %v91_v17  ;;  %v129_v30 = vld [vmem:[%s913_s2 + $0x10] sm:$0xf]  ;;  %v130_v35 = vld [vmem:[%s913_s2 + $0x14] sm:$0xf] }
   0x8   :  { %v164_v24 = vld [vmem:[%s914_s3 + $0xc] sm:$0xf]  ;;  %v93_v29 = vmax.bf16 %v57_v26, %v21_v25  ;;  %v165_v31 = vld [vmem:[%s914_s3 + $0x10] sm:$0xf]  ;;  %v166_v36 = vld [vmem:[%s914_s3 + $0x14] sm:$0xf]  ;;  %v94_v38 = vmax.bf16 %v58_v34, %v22_v32 }
   0x9   :  { %270 = vst.msk [vmem:[%s915_s4] sm:$0xf] %vm269_vm0, %v233_v16  ;;  %v200_v28 = vmax.bf16 %v164_v24, %v128_v21  ;;  %271 = vst.msk [vmem:[%s915_s4 + $0x4] sm:$0xf] %vm269_vm0, %v234_v22  ;;  %v201_v33 = vmax.bf16 %v165_v31, %v129_v30  ;;  %v202_v39 = vmax.bf16 %v166_v36, %v130_v35  ;;  %v23_v40 = vld [vmem:[%s911_s0 + $0x18] sm:$0xf] }
   0xa   :  { %272 = vst.msk [vmem:[%s915_s4 + $0x8] sm:$0xf] %vm269_vm0, %v235_v27  ;;  %v59_v41 = vld [vmem:[%s912_s1 + $0x18] sm:$0xf]  ;;  %v24_v46 = vld [vmem:[%s911_s0 + $0x1c] sm:$0xf] }
   0xb   :  { %v236_v37 = vmax.bf16 %v200_v28, %v92_v23  ;;  %v131_v42 = vld [vmem:[%s913_s2 + $0x18] sm:$0xf]  ;;  %v237_v43 = vmax.bf16 %v201_v33, %v93_v29  ;;  %v95_v44 = vmax.bf16 %v59_v41, %v23_v40  ;;  %v60_v47 = vld [vmem:[%s912_s1 + $0x1c] sm:$0xf]  ;;  %v238_v48 = vmax.bf16 %v202_v39, %v94_v38  ;;  %v25_v53 = vld [vmem:[%s911_s0 + $0x20] sm:$0xf] }
   0xc   :  { %v167_v45 = vld [vmem:[%s914_s3 + $0x18] sm:$0xf]  ;;  %v96_v50 = vmax.bf16 %v60_v47, %v24_v46  ;;  %v132_v51 = vld [vmem:[%s913_s2 + $0x1c] sm:$0xf]  ;;  %v61_v55 = vld [vmem:[%s912_s1 + $0x20] sm:$0xf] }
   0xd   :  { %273 = vst.msk [vmem:[%s915_s4 + $0xc] sm:$0xf] %vm269_vm0, %v236_v37  ;;  %v203_v49 = vmax.bf16 %v167_v45, %v131_v42  ;;  %v168_v52 = vld [vmem:[%s914_s3 + $0x1c] sm:$0xf]  ;;  %274 = vst.msk [vmem:[%s915_s4 + $0x10] sm:$0xf] %vm269_vm0, %v237_v43  ;;  %v97_v59 = vmax.bf16 %v61_v55, %v25_v53 }
   0xe   :  { %v204_v54 = vmax.bf16 %v168_v52, %v132_v51  ;;  %v133_v56 = vld [vmem:[%s913_s2 + $0x20] sm:$0xf]  ;;  %275 = vst.msk [vmem:[%s915_s4 + $0x14] sm:$0xf] %vm269_vm0, %v238_v48  ;;  %v26_v61 = vld [vmem:[%s911_s0 + $0x24] sm:$0xf] }
   0xf   :  { %v169_v57 = vld [vmem:[%s914_s3 + $0x20] sm:$0xf]  ;;  %v239_v58 = vmax.bf16 %v203_v49, %v95_v44  ;;  %v62_v62 = vld [vmem:[%s912_s1 + $0x24] sm:$0xf]  ;;  %v27_v3 = vld [vmem:[%s911_s0 + $0x28] sm:$0xf] }
  0x10   :  { %v205_v60 = vmax.bf16 %v169_v57, %v133_v56  ;;  %v134_v63 = vld [vmem:[%s913_s2 + $0x24] sm:$0xf]  ;;  %v240_v0 = vmax.bf16 %v204_v54, %v96_v50  ;;  %v98_v1 = vmax.bf16 %v62_v62, %v26_v61  ;;  %v63_v4 = vld [vmem:[%s912_s1 + $0x28] sm:$0xf]  ;;  %v28_v10 = vld [vmem:[%s911_s0 + $0x2c] sm:$0xf] }
  0x11   :  { %v170_v2 = vld [vmem:[%s914_s3 + $0x24] sm:$0xf]  ;;  %276 = vst.msk [vmem:[%s915_s4 + $0x18] sm:$0xf] %vm269_vm0, %v239_v58  ;;  %v99_v7 = vmax.bf16 %v63_v4, %v27_v3  ;;  %v135_v8 = vld [vmem:[%s913_s2 + $0x28] sm:$0xf] }
  0x12   :  { %v241_v5 = vmax.bf16 %v205_v60, %v97_v59  ;;  %v206_v6 = vmax.bf16 %v170_v2, %v134_v63  ;;  %v171_v9 = vld [vmem:[%s914_s3 + $0x28] sm:$0xf]  ;;  %277 = vst.msk [vmem:[%s915_s4 + $0x1c] sm:$0xf] %vm269_vm0, %v240_v0  ;;  %v64_v12 = vld [vmem:[%s912_s1 + $0x2c] sm:$0xf] }
  0x13   :  { %v207_v11 = vmax.bf16 %v171_v9, %v135_v8  ;;  %v136_v13 = vld [vmem:[%s913_s2 + $0x2c] sm:$0xf]  ;;  %v100_v16 = vmax.bf16 %v64_v12, %v28_v10  ;;  %v29_v18 = vld [vmem:[%s911_s0 + $0x30] sm:$0xf]  ;;  %v30_v24 = vld [vmem:[%s911_s0 + $0x34] sm:$0xf] }
  0x14   :  { %v172_v14 = vld [vmem:[%s914_s3 + $0x2c] sm:$0xf]  ;;  %278 = vst.msk [vmem:[%s915_s4 + $0x20] sm:$0xf] %vm269_vm0, %v241_v5  ;;  %v242_v15 = vmax.bf16 %v206_v6, %v98_v1  ;;  %v65_v19 = vld [vmem:[%s912_s1 + $0x30] sm:$0xf] }
  0x15   :  { %v208_v17 = vmax.bf16 %v172_v14, %v136_v13  ;;  %v137_v20 = vld [vmem:[%s913_s2 + $0x30] sm:$0xf]  ;;  %v243_v21 = vmax.bf16 %v207_v11, %v99_v7  ;;  %v101_v22 = vmax.bf16 %v65_v19, %v29_v18  ;;  %v66_v25 = vld [vmem:[%s912_s1 + $0x34] sm:$0xf]  ;;  %v31_v31 = vld [vmem:[%s911_s0 + $0x38] sm:$0xf] }
  0x16   :  { %v173_v23 = vld [vmem:[%s914_s3 + $0x30] sm:$0xf]  ;;  %279 = vst.msk [vmem:[%s915_s4 + $0x24] sm:$0xf] %vm269_vm0, %v242_v15  ;;  %v102_v28 = vmax.bf16 %v66_v25, %v30_v24  ;;  %v138_v29 = vld [vmem:[%s913_s2 + $0x34] sm:$0xf] }
  0x17   :  { %v244_v26 = vmax.bf16 %v208_v17, %v100_v16  ;;  %v209_v27 = vmax.bf16 %v173_v23, %v137_v20  ;;  %v174_v30 = vld [vmem:[%s914_s3 + $0x34] sm:$0xf]  ;;  %280 = vst.msk [vmem:[%s915_s4 + $0x28] sm:$0xf] %vm269_vm0, %v243_v21  ;;  %v67_v33 = vld [vmem:[%s912_s1 + $0x38] sm:$0xf] }
  0x18   :  { %v210_v32 = vmax.bf16 %v174_v30, %v138_v29  ;;  %v139_v34 = vld [vmem:[%s913_s2 + $0x38] sm:$0xf]  ;;  %v103_v37 = vmax.bf16 %v67_v33, %v31_v31  ;;  %v32_v39 = vld [vmem:[%s911_s0 + $0x3c] sm:$0xf]  ;;  %v33_v45 = vld [vmem:[%s911_s0 + $0x40] sm:$0xf] }
  0x19   :  { %v175_v35 = vld [vmem:[%s914_s3 + $0x38] sm:$0xf]  ;;  %281 = vst.msk [vmem:[%s915_s4 + $0x2c] sm:$0xf] %vm269_vm0, %v244_v26  ;;  %v245_v36 = vmax.bf16 %v209_v27, %v101_v22  ;;  %v68_v40 = vld [vmem:[%s912_s1 + $0x3c] sm:$0xf] }
  0x1a   :  { %v211_v38 = vmax.bf16 %v175_v35, %v139_v34  ;;  %v140_v41 = vld [vmem:[%s913_s2 + $0x3c] sm:$0xf]  ;;  %v246_v42 = vmax.bf16 %v210_v32, %v102_v28  ;;  %v104_v43 = vmax.bf16 %v68_v40, %v32_v39  ;;  %v69_v46 = vld [vmem:[%s912_s1 + $0x40] sm:$0xf]  ;;  %v34_v52 = vld [vmem:[%s911_s0 + $0x44] sm:$0xf] }
  0x1b   :  { %v176_v44 = vld [vmem:[%s914_s3 + $0x3c] sm:$0xf]  ;;  %282 = vst.msk [vmem:[%s915_s4 + $0x30] sm:$0xf] %vm269_vm0, %v245_v36  ;;  %v105_v49 = vmax.bf16 %v69_v46, %v33_v45  ;;  %v141_v50 = vld [vmem:[%s913_s2 + $0x40] sm:$0xf] }
  0x1c   :  { %v247_v47 = vmax.bf16 %v211_v38, %v103_v37  ;;  %v212_v48 = vmax.bf16 %v176_v44, %v140_v41  ;;  %v177_v51 = vld [vmem:[%s914_s3 + $0x40] sm:$0xf]  ;;  %283 = vst.msk [vmem:[%s915_s4 + $0x34] sm:$0xf] %vm269_vm0, %v246_v42  ;;  %v70_v54 = vld [vmem:[%s912_s1 + $0x44] sm:$0xf] }
  0x1d   :  { %v213_v53 = vmax.bf16 %v177_v51, %v141_v50  ;;  %v142_v55 = vld [vmem:[%s913_s2 + $0x44] sm:$0xf]  ;;  %v106_v58 = vmax.bf16 %v70_v54, %v34_v52  ;;  %v35_v60 = vld [vmem:[%s911_s0 + $0x48] sm:$0xf]  ;;  %v36_v2 = vld [vmem:[%s911_s0 + $0x4c] sm:$0xf] }
  0x1e   :  { %v178_v56 = vld [vmem:[%s914_s3 + $0x44] sm:$0xf]  ;;  %284 = vst.msk [vmem:[%s915_s4 + $0x38] sm:$0xf] %vm269_vm0, %v247_v47  ;;  %v248_v57 = vmax.bf16 %v212_v48, %v104_v43  ;;  %v71_v61 = vld [vmem:[%s912_s1 + $0x48] sm:$0xf] }
  0x1f   :  { %v214_v59 = vmax.bf16 %v178_v56, %v142_v55  ;;  %v143_v62 = vld [vmem:[%s913_s2 + $0x48] sm:$0xf]  ;;  %v249_v63 = vmax.bf16 %v213_v53, %v105_v49  ;;  %v107_v0 = vmax.bf16 %v71_v61, %v35_v60  ;;  %v72_v3 = vld [vmem:[%s912_s1 + $0x4c] sm:$0xf]  ;;  %v37_v9 = vld [vmem:[%s911_s0 + $0x50] sm:$0xf] }
  0x20   :  { %v179_v1 = vld [vmem:[%s914_s3 + $0x48] sm:$0xf]  ;;  %285 = vst.msk [vmem:[%s915_s4 + $0x3c] sm:$0xf] %vm269_vm0, %v248_v57  ;;  %v108_v6 = vmax.bf16 %v72_v3, %v36_v2  ;;  %v144_v7 = vld [vmem:[%s913_s2 + $0x4c] sm:$0xf] }
  0x21   :  { %v250_v4 = vmax.bf16 %v214_v59, %v106_v58  ;;  %v215_v5 = vmax.bf16 %v179_v1, %v143_v62  ;;  %v180_v8 = vld [vmem:[%s914_s3 + $0x4c] sm:$0xf]  ;;  %286 = vst.msk [vmem:[%s915_s4 + $0x40] sm:$0xf] %vm269_vm0, %v249_v63  ;;  %v73_v11 = vld [vmem:[%s912_s1 + $0x50] sm:$0xf] }
  0x22   :  { %v216_v10 = vmax.bf16 %v180_v8, %v144_v7  ;;  %v145_v12 = vld [vmem:[%s913_s2 + $0x50] sm:$0xf]  ;;  %v109_v15 = vmax.bf16 %v73_v11, %v37_v9  ;;  %v38_v17 = vld [vmem:[%s911_s0 + $0x54] sm:$0xf]  ;;  %v39_v23 = vld [vmem:[%s911_s0 + $0x58] sm:$0xf] }
  0x23   :  { %v181_v13 = vld [vmem:[%s914_s3 + $0x50] sm:$0xf]  ;;  %287 = vst.msk [vmem:[%s915_s4 + $0x44] sm:$0xf] %vm269_vm0, %v250_v4  ;;  %v251_v14 = vmax.bf16 %v215_v5, %v107_v0  ;;  %v74_v18 = vld [vmem:[%s912_s1 + $0x54] sm:$0xf] }
  0x24   :  { %v217_v16 = vmax.bf16 %v181_v13, %v145_v12  ;;  %v146_v19 = vld [vmem:[%s913_s2 + $0x54] sm:$0xf]  ;;  %v252_v20 = vmax.bf16 %v216_v10, %v108_v6  ;;  %v110_v21 = vmax.bf16 %v74_v18, %v38_v17  ;;  %v75_v24 = vld [vmem:[%s912_s1 + $0x58] sm:$0xf]  ;;  %v40_v30 = vld [vmem:[%s911_s0 + $0x5c] sm:$0xf] }
  0x25   :  { %v182_v22 = vld [vmem:[%s914_s3 + $0x54] sm:$0xf]  ;;  %288 = vst.msk [vmem:[%s915_s4 + $0x48] sm:$0xf] %vm269_vm0, %v251_v14  ;;  %v111_v27 = vmax.bf16 %v75_v24, %v39_v23  ;;  %v147_v28 = vld [vmem:[%s913_s2 + $0x58] sm:$0xf] }
  0x26   :  { %v253_v25 = vmax.bf16 %v217_v16, %v109_v15  ;;  %v218_v26 = vmax.bf16 %v182_v22, %v146_v19  ;;  %v183_v29 = vld [vmem:[%s914_s3 + $0x58] sm:$0xf]  ;;  %289 = vst.msk [vmem:[%s915_s4 + $0x4c] sm:$0xf] %vm269_vm0, %v252_v20  ;;  %v76_v32 = vld [vmem:[%s912_s1 + $0x5c] sm:$0xf] }
  0x27   :  { %v219_v31 = vmax.bf16 %v183_v29, %v147_v28  ;;  %v148_v33 = vld [vmem:[%s913_s2 + $0x5c] sm:$0xf]  ;;  %v112_v36 = vmax.bf16 %v76_v32, %v40_v30  ;;  %v41_v38 = vld [vmem:[%s911_s0 + $0x60] sm:$0xf]  ;;  %v42_v44 = vld [vmem:[%s911_s0 + $0x64] sm:$0xf] }
  0x28   :  { %v184_v34 = vld [vmem:[%s914_s3 + $0x5c] sm:$0xf]  ;;  %290 = vst.msk [vmem:[%s915_s4 + $0x50] sm:$0xf] %vm269_vm0, %v253_v25  ;;  %v254_v35 = vmax.bf16 %v218_v26, %v110_v21  ;;  %v77_v39 = vld [vmem:[%s912_s1 + $0x60] sm:$0xf] }
  0x29   :  { %v220_v37 = vmax.bf16 %v184_v34, %v148_v33  ;;  %v149_v40 = vld [vmem:[%s913_s2 + $0x60] sm:$0xf]  ;;  %v255_v41 = vmax.bf16 %v219_v31, %v111_v27  ;;  %v113_v42 = vmax.bf16 %v77_v39, %v41_v38  ;;  %v78_v45 = vld [vmem:[%s912_s1 + $0x64] sm:$0xf]  ;;  %v43_v51 = vld [vmem:[%s911_s0 + $0x68] sm:$0xf] }
  0x2a   :  { %v185_v43 = vld [vmem:[%s914_s3 + $0x60] sm:$0xf]  ;;  %291 = vst.msk [vmem:[%s915_s4 + $0x54] sm:$0xf] %vm269_vm0, %v254_v35  ;;  %v114_v48 = vmax.bf16 %v78_v45, %v42_v44  ;;  %v150_v49 = vld [vmem:[%s913_s2 + $0x64] sm:$0xf] }
  0x2b   :  { %v256_v46 = vmax.bf16 %v220_v37, %v112_v36  ;;  %v221_v47 = vmax.bf16 %v185_v43, %v149_v40  ;;  %v186_v50 = vld [vmem:[%s914_s3 + $0x64] sm:$0xf]  ;;  %292 = vst.msk [vmem:[%s915_s4 + $0x58] sm:$0xf] %vm269_vm0, %v255_v41  ;;  %v79_v53 = vld [vmem:[%s912_s1 + $0x68] sm:$0xf] }
  0x2c   :  { %v222_v52 = vmax.bf16 %v186_v50, %v150_v49  ;;  %v151_v54 = vld [vmem:[%s913_s2 + $0x68] sm:$0xf]  ;;  %v115_v57 = vmax.bf16 %v79_v53, %v43_v51  ;;  %v44_v59 = vld [vmem:[%s911_s0 + $0x6c] sm:$0xf]  ;;  %v45_v1 = vld [vmem:[%s911_s0 + $0x70] sm:$0xf] }
  0x2d   :  { %v187_v55 = vld [vmem:[%s914_s3 + $0x68] sm:$0xf]  ;;  %293 = vst.msk [vmem:[%s915_s4 + $0x5c] sm:$0xf] %vm269_vm0, %v256_v46  ;;  %v257_v56 = vmax.bf16 %v221_v47, %v113_v42  ;;  %v80_v60 = vld [vmem:[%s912_s1 + $0x6c] sm:$0xf] }
  0x2e   :  { %v223_v58 = vmax.bf16 %v187_v55, %v151_v54  ;;  %v152_v61 = vld [vmem:[%s913_s2 + $0x6c] sm:$0xf]  ;;  %v258_v62 = vmax.bf16 %v222_v52, %v114_v48  ;;  %v116_v63 = vmax.bf16 %v80_v60, %v44_v59  ;;  %v81_v2 = vld [vmem:[%s912_s1 + $0x70] sm:$0xf]  ;;  %v46_v8 = vld [vmem:[%s911_s0 + $0x74] sm:$0xf] }
  0x2f   :  { %v188_v0 = vld [vmem:[%s914_s3 + $0x6c] sm:$0xf]  ;;  %294 = vst.msk [vmem:[%s915_s4 + $0x60] sm:$0xf] %vm269_vm0, %v257_v56  ;;  %v117_v5 = vmax.bf16 %v81_v2, %v45_v1  ;;  %v153_v6 = vld [vmem:[%s913_s2 + $0x70] sm:$0xf] }
  0x30   :  { %v259_v3 = vmax.bf16 %v223_v58, %v115_v57  ;;  %v224_v4 = vmax.bf16 %v188_v0, %v152_v61  ;;  %v189_v7 = vld [vmem:[%s914_s3 + $0x70] sm:$0xf]  ;;  %295 = vst.msk [vmem:[%s915_s4 + $0x64] sm:$0xf] %vm269_vm0, %v258_v62  ;;  %v82_v10 = vld [vmem:[%s912_s1 + $0x74] sm:$0xf] }
  0x31   :  { %v225_v9 = vmax.bf16 %v189_v7, %v153_v6  ;;  %v154_v11 = vld [vmem:[%s913_s2 + $0x74] sm:$0xf]  ;;  %v118_v14 = vmax.bf16 %v82_v10, %v46_v8  ;;  %v47_v16 = vld [vmem:[%s911_s0 + $0x78] sm:$0xf]  ;;  %v48_v22 = vld [vmem:[%s911_s0 + $0x7c] sm:$0xf] }
  0x32   :  { %v190_v12 = vld [vmem:[%s914_s3 + $0x74] sm:$0xf]  ;;  %296 = vst.msk [vmem:[%s915_s4 + $0x68] sm:$0xf] %vm269_vm0, %v259_v3  ;;  %v260_v13 = vmax.bf16 %v224_v4, %v116_v63  ;;  %v83_v17 = vld [vmem:[%s912_s1 + $0x78] sm:$0xf] }
  0x33   :  { %v226_v15 = vmax.bf16 %v190_v12, %v154_v11  ;;  %v155_v18 = vld [vmem:[%s913_s2 + $0x78] sm:$0xf]  ;;  %v261_v19 = vmax.bf16 %v225_v9, %v117_v5  ;;  %v119_v20 = vmax.bf16 %v83_v17, %v47_v16  ;;  %v84_v23 = vld [vmem:[%s912_s1 + $0x7c] sm:$0xf]  ;;  %v49_v29 = vld [vmem:[%s911_s0 + $0x80] sm:$0xf] }
  0x34   :  { %v191_v21 = vld [vmem:[%s914_s3 + $0x78] sm:$0xf]  ;;  %297 = vst.msk [vmem:[%s915_s4 + $0x6c] sm:$0xf] %vm269_vm0, %v260_v13  ;;  %v120_v26 = vmax.bf16 %v84_v23, %v48_v22  ;;  %v156_v27 = vld [vmem:[%s913_s2 + $0x7c] sm:$0xf] }
  0x35   :  { %v262_v24 = vmax.bf16 %v226_v15, %v118_v14  ;;  %v227_v25 = vmax.bf16 %v191_v21, %v155_v18  ;;  %v192_v28 = vld [vmem:[%s914_s3 + $0x7c] sm:$0xf]  ;;  %298 = vst.msk [vmem:[%s915_s4 + $0x70] sm:$0xf] %vm269_vm0, %v261_v19  ;;  %v85_v31 = vld [vmem:[%s912_s1 + $0x80] sm:$0xf] }
  0x36   :  { %v228_v30 = vmax.bf16 %v192_v28, %v156_v27  ;;  %v157_v32 = vld [vmem:[%s913_s2 + $0x80] sm:$0xf]  ;;  %v121_v35 = vmax.bf16 %v85_v31, %v49_v29  ;;  %v50_v37 = vld [vmem:[%s911_s0 + $0x84] sm:$0xf]  ;;  %v51_v43 = vld [vmem:[%s911_s0 + $0x88] sm:$0xf] }
  0x37   :  { %v193_v33 = vld [vmem:[%s914_s3 + $0x80] sm:$0xf]  ;;  %299 = vst.msk [vmem:[%s915_s4 + $0x74] sm:$0xf] %vm269_vm0, %v262_v24  ;;  %v263_v34 = vmax.bf16 %v227_v25, %v119_v20  ;;  %v86_v38 = vld [vmem:[%s912_s1 + $0x84] sm:$0xf] }
  0x38   :  { %v229_v36 = vmax.bf16 %v193_v33, %v157_v32  ;;  %v158_v39 = vld [vmem:[%s913_s2 + $0x84] sm:$0xf]  ;;  %v264_v40 = vmax.bf16 %v228_v30, %v120_v26  ;;  %v122_v41 = vmax.bf16 %v86_v38, %v50_v37  ;;  %v87_v44 = vld [vmem:[%s912_s1 + $0x88] sm:$0xf]  ;;  %v52_v50 = vld [vmem:[%s911_s0 + $0x8c] sm:$0xf] }
  0x39   :  { %v194_v42 = vld [vmem:[%s914_s3 + $0x84] sm:$0xf]  ;;  %300 = vst.msk [vmem:[%s915_s4 + $0x78] sm:$0xf] %vm269_vm0, %v263_v34  ;;  %v123_v47 = vmax.bf16 %v87_v44, %v51_v43  ;;  %v159_v48 = vld [vmem:[%s913_s2 + $0x88] sm:$0xf] }
  0x3a   :  { %v265_v45 = vmax.bf16 %v229_v36, %v121_v35  ;;  %v230_v46 = vmax.bf16 %v194_v42, %v158_v39  ;;  %v195_v49 = vld [vmem:[%s914_s3 + $0x88] sm:$0xf]  ;;  %301 = vst.msk [vmem:[%s915_s4 + $0x7c] sm:$0xf] %vm269_vm0, %v264_v40  ;;  %v88_v52 = vld [vmem:[%s912_s1 + $0x8c] sm:$0xf] }
  0x3b   :  { %v231_v51 = vmax.bf16 %v195_v49, %v159_v48  ;;  %v160_v53 = vld [vmem:[%s913_s2 + $0x8c] sm:$0xf]  ;;  %v124_v56 = vmax.bf16 %v88_v52, %v52_v50 }
  0x3c   :  { %v196_v54 = vld [vmem:[%s914_s3 + $0x8c] sm:$0xf]  ;;  %302 = vst.msk [vmem:[%s915_s4 + $0x80] sm:$0xf] %vm269_vm0, %v265_v45  ;;  %v266_v55 = vmax.bf16 %v230_v46, %v122_v41 }
  0x3d   :  { %v232_v57 = vmax.bf16 %v196_v54, %v160_v53  ;;  %v267_v58 = vmax.bf16 %v231_v51, %v123_v47 }
  0x3e   :  { %303 = vst.msk [vmem:[%s915_s4 + $0x84] sm:$0xf] %vm269_vm0, %v266_v55 }
  0x3f   :  { %v268_v59 = vmax.bf16 %v232_v57, %v124_v56  ;;  %304 = vst.msk [vmem:[%s915_s4 + $0x88] sm:$0xf] %vm269_vm0, %v267_v58 }
  0x41   :  { %305 = vst.msk [vmem:[%s915_s4 + $0x8c] sm:$0xf] %vm269_vm0, %v268_v59 }

// kernel: cnn_femnist_forward.7
= control target key start
LH: loop header
LB: loop body
LE: loop exit
PB: predicated region body
PF: predicated region fallthrough
CT: control target
= control target key end

     0   :  { %vm130_vm0 = vcmask 818176   ;;  %vm155_vm1 = vcmask 1041408   ;;  %vm336_vm2 = vcmask 93184   ;;  %s629_s1 = inlined_call_operand.vmem [shape: bf16[100,12], index: 1, kind: input, shape index: {}]   ;;  %s630_s0 = inlined_call_operand.vmem [shape: bf16[128,100], index: 0, kind: input, shape index: {}]   ;;  %s631_s2 = inlined_call_operand.vmem [shape: f32[1,12], index: 2, kind: input, shape index: {}]   ;;  %s632_s3 = inlined_call_operand.vmem [shape: bf16[128,12], index: 3, kind: output, shape index: {}]  }
   0x1   :  { %v474_v0 = vld [vmem:[%s629_s1] sm:$0xff]   ;;  %v475_v1 = vld [vmem:[%s629_s1 + $0x8] sm:$0xff]   ;;  %v476_v2 = vld [vmem:[%s629_s1 + $0x10] sm:$0xff]  }
   0x2   :  { %428 = vmatprep.subr.bf16.mxu0 %v474_v0  ;;  %458 = vmatprep.subr.bf16.mxu1 %v474_v0  ;;  %v477_v3 = vld [vmem:[%s629_s1 + $0x18] sm:$0xff]   ;;  %v481_v4 = vld [vmem:[%s630_s0] sm:$0xff]   ;;  %v479_v7 = vld [vmem:[%s629_s1 + $0x28] sm:$0xff]  }
   0x3   :  { %429 = vmatpush3.bf16.msra.mxu0 %v474_v0  ;;  %465 = vmatpush3.bf16.msra.mxu1 %v474_v0  ;;  %v482_v5 = vld [vmem:[%s630_s0 + $0x20] sm:$0xff]   ;;  %v480_v8 = vld [vmem:[%s629_s1 + $0x30] ss:$0 sps:$4 sm:$0x33]   ;;  %v483_v10 = vld [vmem:[%s630_s0 + $0x8] sm:$0xff]  }
   0x4   :  { %430 = vmatprep.subr.bf16.mxu0 %v475_v1  ;;  %459 = vmatprep.subr.bf16.mxu1 %v475_v1  ;;  %v478_v6 = vld [vmem:[%s629_s1 + $0x20] sm:$0xff]   ;;  %v157_v9 = vsel %vm155_vm1, %v480_v8, 0  ;;  %v484_v11 = vld [vmem:[%s630_s0 + $0x28] sm:$0xff]   ;;  %v485_v12 = vld [vmem:[%s630_s0 + $0x10] sm:$0xff]  }
   0x5   :  { %442 = vmatprep.mubr.msk.bf16.mxu0 %vm130_vm0, %v481_v4  ;;  %450 = vmatprep.mubr.msk.bf16.mxu1 %vm130_vm0, %v482_v5  ;;  %v486_v13 = vld [vmem:[%s630_s0 + $0x30] sm:$0xff]   ;;  %v487_v14 = vld [vmem:[%s630_s0 + $0x18] sm:$0xff]   ;;  %v357_v16 = vld [vmem:[%s631_s2] ss:$0 sm:$0xff] }
   0x6   :  { %v488_v15 = vld [vmem:[%s630_s0 + $0x38] sm:$0xff]  }
   0x7   :  { %431 = vmatpush3.bf16.msra.mxu0 %v475_v1  ;;  %466 = vmatpush3.bf16.msra.mxu1 %v475_v1 }
   0x8   :  { %432 = vmatprep.subr.bf16.mxu0 %v476_v2  ;;  %460 = vmatprep.subr.bf16.mxu1 %v476_v2 }
   0xb   :  { %433 = vmatpush3.bf16.msra.mxu0 %v476_v2  ;;  %467 = vmatpush3.bf16.msra.mxu1 %v476_v2 }
   0xc   :  { %434 = vmatprep.subr.bf16.mxu0 %v477_v3  ;;  %461 = vmatprep.subr.bf16.mxu1 %v477_v3 }
   0xf   :  { %435 = vmatpush3.bf16.msra.mxu0 %v477_v3  ;;  %468 = vmatpush3.bf16.msra.mxu1 %v477_v3 }
  0x10   :  { %436 = vmatprep.subr.bf16.mxu0 %v478_v6  ;;  %462 = vmatprep.subr.bf16.mxu1 %v478_v6 }
  0x13   :  { %437 = vmatpush3.bf16.msra.mxu0 %v478_v6  ;;  %469 = vmatpush3.bf16.msra.mxu1 %v478_v6 }
  0x14   :  { %438 = vmatprep.subr.bf16.mxu0 %v479_v7  ;;  %463 = vmatprep.subr.bf16.mxu1 %v479_v7 }
  0x17   :  { %439 = vmatpush3.bf16.msra.mxu0 %v479_v7  ;;  %470 = vmatpush3.bf16.msra.mxu1 %v479_v7 }
  0x18   :  { %472 = vmatprep.subr.msk.bf16.mxu0 %vm155_vm1, %v480_v8  ;;  %473 = vmatprep.subr.msk.bf16.mxu1 %vm155_vm1, %v480_v8 }
  0x1b   :  { %441 = vmatpush3.bf16.msra.mxu0 %v157_v9  ;;  %471 = vmatpush3.bf16.msra.mxu1 %v157_v9 }
  0x1e   :  { %443 = vmatmul.mubr.msk.bf16.vlgmr.msra.gmra.mrb[0].mxu0 %vm130_vm0, %v483_v10  ;;  %451 = vmatmul.mubr.msk.bf16.vlgmr.msra.gmra.mrb[0].mxu1 %vm130_vm0, %v484_v11 }
  0x1f   :  { %446 = vmatprep.mubr.msk.bf16.mxu0 %vm130_vm0, %v485_v12  ;;  %454 = vmatprep.mubr.msk.bf16.mxu1 %vm130_vm0, %v486_v13 }
  0x26   :  { %447 = vmatmul.mubr.msk.bf16.gmra.mrb[4].mxu0 %vm130_vm0, %v487_v14  ;;  %455 = vmatmul.mubr.msk.bf16.gmra.mrb[4].mxu1 %vm130_vm0, %v488_v15 }
  0xf1   :  { %v444_v17 = vpop.f32.mrb[0].mxu0  ;;  %v452_v18 = vpop.f32.mrb[0].mxu1 }
  0xf2   :  { %v202_v19 = vadd.f32 %v444_v17, %v357_v16  ;;  %v234_v20 = vadd.f32 %v452_v18, %v357_v16  ;;  %v193_v21 = vpop.f32.mrb[1].mxu0  ;;  %v225_v22 = vpop.f32.mrb[1].mxu1 }
  0xf3   :  { %v194_v23 = vadd.f32 %v357_v16, %v193_v21  ;;  %v226_v24 = vadd.f32 %v357_v16, %v225_v22  ;;  %v445_v25 = vpop.f32.mrb[2].mxu0  ;;  %v453_v26 = vpop.f32.mrb[2].mxu1 }
  0xf4   :  { %v258_v27 = vmax.f32 %v202_v19, 0.0  ;;  %v266_v28 = vmax.f32 %v234_v20, 0.0  ;;  %v205_v29 = vadd.f32 %v445_v25, %v357_v16  ;;  %v237_v30 = vadd.f32 %v453_v26, %v357_v16  ;;  %v196_v31 = vpop.f32.mrb[3].mxu0  ;;  %v228_v32 = vpop.f32.mrb[3].mxu1 }
  0xf5   :  { %v256_v33 = vmax.f32 %v194_v23, 0.0  ;;  %v264_v34 = vmax.f32 %v226_v24, 0.0  ;;  %v197_v35 = vadd.f32 %v357_v16, %v196_v31  ;;  %v229_v36 = vadd.f32 %v357_v16, %v228_v32 }
  0xf6   :  { %v399_v37 = vpack.c.bf16 %v258_v27, %v258_v27  ;;  %v407_v38 = vpack.c.bf16 %v266_v28, %v266_v28  ;;  %v259_v39 = vmax.f32 %v205_v29, 0.0  ;;  %v267_v40 = vmax.f32 %v237_v30, 0.0 }
  0xf7   :  { %v397_v41 = vpack.c.bf16 %v256_v33, %v256_v33  ;;  %v405_v42 = vpack.c.bf16 %v264_v34, %v264_v34  ;;  %v257_v43 = vmax.f32 %v197_v35, 0.0  ;;  %v265_v44 = vmax.f32 %v229_v36, 0.0 }
  0xf8   :  { %339 = vst.msk [vmem:[%s632_s3 + $0x8] sm:$0xf] %vm336_vm2, %v399_v37  ;;  %347 = vst.msk [vmem:[%s632_s3 + $0x28] sm:$0xf] %vm336_vm2, %v407_v38  ;;  %v400_v45 = vpack.c.bf16 %v259_v39, %v259_v39  ;;  %v408_v46 = vpack.c.bf16 %v267_v40, %v267_v40 }
  0xf9   :  { %337 = vst.msk [vmem:[%s632_s3] sm:$0xf] %vm336_vm2, %v397_v41  ;;  %345 = vst.msk [vmem:[%s632_s3 + $0x20] sm:$0xf] %vm336_vm2, %v405_v42  ;;  %v398_v47 = vpack.c.bf16 %v257_v43, %v257_v43  ;;  %v406_v48 = vpack.c.bf16 %v265_v44, %v265_v44  ;;  %v448_v49 = vpop.f32.mrb[4].mxu0  ;;  %v456_v50 = vpop.f32.mrb[4].mxu1 }
  0xfa   :  { %340 = vst.msk [vmem:[%s632_s3 + $0xc] sm:$0xf] %vm336_vm2, %v400_v45  ;;  %348 = vst.msk [vmem:[%s632_s3 + $0x2c] sm:$0xf] %vm336_vm2, %v408_v46  ;;  %v218_v51 = vadd.f32 %v448_v49, %v357_v16  ;;  %v250_v52 = vadd.f32 %v456_v50, %v357_v16  ;;  %v209_v53 = vpop.f32.mrb[5].mxu0  ;;  %v241_v54 = vpop.f32.mrb[5].mxu1 }
  0xfb   :  { %338 = vst.msk [vmem:[%s632_s3 + $0x4] sm:$0xf] %vm336_vm2, %v398_v47  ;;  %346 = vst.msk [vmem:[%s632_s3 + $0x24] sm:$0xf] %vm336_vm2, %v406_v48  ;;  %v210_v55 = vadd.f32 %v357_v16, %v209_v53  ;;  %v242_v56 = vadd.f32 %v357_v16, %v241_v54  ;;  %v449_v57 = vpop.f32.mrb[6].mxu0  ;;  %v457_v58 = vpop.f32.mrb[6].mxu1 }
  0xfc   :  { %v262_v59 = vmax.f32 %v218_v51, 0.0  ;;  %v270_v60 = vmax.f32 %v250_v52, 0.0  ;;  %v221_v61 = vadd.f32 %v449_v57, %v357_v16  ;;  %v253_v62 = vadd.f32 %v457_v58, %v357_v16  ;;  %v212_v63 = vpop.f32.mrb[7].mxu0  ;;  %v244_v0 = vpop.f32.mrb[7].mxu1 }
  0xfd   :  { %v260_v1 = vmax.f32 %v210_v55, 0.0  ;;  %v268_v2 = vmax.f32 %v242_v56, 0.0  ;;  %v213_v3 = vadd.f32 %v357_v16, %v212_v63  ;;  %v245_v4 = vadd.f32 %v357_v16, %v244_v0 }
  0xfe   :  { %v403_v5 = vpack.c.bf16 %v262_v59, %v262_v59  ;;  %v411_v6 = vpack.c.bf16 %v270_v60, %v270_v60  ;;  %v263_v7 = vmax.f32 %v221_v61, 0.0  ;;  %v271_v8 = vmax.f32 %v253_v62, 0.0 }
  0xff   :  { %v401_v9 = vpack.c.bf16 %v260_v1, %v260_v1  ;;  %v409_v10 = vpack.c.bf16 %v268_v2, %v268_v2  ;;  %v261_v11 = vmax.f32 %v213_v3, 0.0  ;;  %v269_v12 = vmax.f32 %v245_v4, 0.0 }
 0x100   :  { %343 = vst.msk [vmem:[%s632_s3 + $0x18] sm:$0xf] %vm336_vm2, %v403_v5  ;;  %351 = vst.msk [vmem:[%s632_s3 + $0x38] sm:$0xf] %vm336_vm2, %v411_v6  ;;  %v404_v13 = vpack.c.bf16 %v263_v7, %v263_v7  ;;  %v412_v14 = vpack.c.bf16 %v271_v8, %v271_v8 }
 0x101   :  { %341 = vst.msk [vmem:[%s632_s3 + $0x10] sm:$0xf] %vm336_vm2, %v401_v9  ;;  %349 = vst.msk [vmem:[%s632_s3 + $0x30] sm:$0xf] %vm336_vm2, %v409_v10  ;;  %v402_v15 = vpack.c.bf16 %v261_v11, %v261_v11  ;;  %v410_v16 = vpack.c.bf16 %v269_v12, %v269_v12 }
 0x102   :  { %344 = vst.msk [vmem:[%s632_s3 + $0x1c] sm:$0xf] %vm336_vm2, %v404_v13  ;;  %352 = vst.msk [vmem:[%s632_s3 + $0x3c] sm:$0xf] %vm336_vm2, %v412_v14 }
 0x103   :  { %342 = vst.msk [vmem:[%s632_s3 + $0x14] sm:$0xf] %vm336_vm2, %v402_v15  ;;  %350 = vst.msk [vmem:[%s632_s3 + $0x34] sm:$0xf] %vm336_vm2, %v410_v16 }

// kernel: cnn_femnist_forward.8
= control target key start
LH: loop header
LB: loop body
LE: loop exit
PB: predicated region body
PF: predicated region fallthrough
CT: control target
= control target key end

     0   :  { %vm45_vm0 = vcmask 93184   ;;  %s143_s0 = inlined_call_operand.vmem [shape: bf16[32,12], index: 0, kind: input, shape index: {}]   ;;  %s144_s1 = inlined_call_operand.vmem [shape: bf16[32,12], index: 1, kind: input, shape index: {}]   ;;  %s145_s2 = inlined_call_operand.vmem [shape: bf16[32,12], index: 2, kind: input, shape index: {}]   ;;  %s146_s3 = inlined_call_operand.vmem [shape: bf16[32,12], index: 3, kind: input, shape index: {}]   ;;  %s147_s4 = inlined_call_operand.vmem [shape: bf16[32,12], index: 4, kind: output, shape index: {}]  }
   0x1   :  { %v17_v0 = vld [vmem:[%s143_s0] sm:$0xf]  ;;  %v18_v5 = vld [vmem:[%s143_s0 + $0x4] sm:$0xf]  ;;  %v19_v11 = vld [vmem:[%s143_s0 + $0x8] sm:$0xf] }
   0x2   :  { %v21_v1 = vld [vmem:[%s144_s1] sm:$0xf]  ;;  %v22_v6 = vld [vmem:[%s144_s1 + $0x4] sm:$0xf]  ;;  %v23_v13 = vld [vmem:[%s144_s1 + $0x8] sm:$0xf] }
   0x3   :  { %v29_v2 = vld [vmem:[%s145_s2] sm:$0xf]  ;;  %v25_v3 = vmax.bf16 %v21_v1, %v17_v0  ;;  %v26_v8 = vmax.bf16 %v22_v6, %v18_v5  ;;  %v30_v9 = vld [vmem:[%s145_s2 + $0x4] sm:$0xf]  ;;  %v31_v14 = vld [vmem:[%s145_s2 + $0x8] sm:$0xf]  ;;  %v27_v17 = vmax.bf16 %v23_v13, %v19_v11 }
   0x4   :  { %v33_v4 = vld [vmem:[%s146_s3] sm:$0xf]  ;;  %v34_v10 = vld [vmem:[%s146_s3 + $0x4] sm:$0xf]  ;;  %v35_v15 = vld [vmem:[%s146_s3 + $0x8] sm:$0xf] }
   0x5   :  { %v37_v7 = vmax.bf16 %v33_v4, %v29_v2  ;;  %v38_v12 = vmax.bf16 %v34_v10, %v30_v9  ;;  %v39_v18 = vmax.bf16 %v35_v15, %v31_v14  ;;  %v20_v19 = vld [vmem:[%s143_s0 + $0xc] sm:$0xf] }
   0x6   :  { %v24_v20 = vld [vmem:[%s144_s1 + $0xc] sm:$0xf] }
   0x7   :  { %v41_v16 = vmax.bf16 %v37_v7, %v25_v3  ;;  %v32_v21 = vld [vmem:[%s145_s2 + $0xc] sm:$0xf]  ;;  %v42_v22 = vmax.bf16 %v38_v12, %v26_v8  ;;  %v28_v23 = vmax.bf16 %v24_v20, %v20_v19  ;;  %v43_v25 = vmax.bf16 %v39_v18, %v27_v17 }
   0x8   :  { %v36_v24 = vld [vmem:[%s146_s3 + $0xc] sm:$0xf] }
   0x9   :  { %46 = vst.msk [vmem:[%s147_s4] sm:$0xf] %vm45_vm0, %v41_v16  ;;  %v40_v26 = vmax.bf16 %v36_v24, %v32_v21  ;;  %47 = vst.msk [vmem:[%s147_s4 + $0x4] sm:$0xf] %vm45_vm0, %v42_v22 }
   0xa   :  { %48 = vst.msk [vmem:[%s147_s4 + $0x8] sm:$0xf] %vm45_vm0, %v43_v25 }
   0xb   :  { %v44_v27 = vmax.bf16 %v40_v26, %v28_v23 }
   0xd   :  { %49 = vst.msk [vmem:[%s147_s4 + $0xc] sm:$0xf] %vm45_vm0, %v44_v27 }

// kernel: cnn_femnist_forward.9
= control target key start
LH: loop header
LB: loop body
LE: loop exit
PB: predicated region body
PF: predicated region fallthrough
CT: control target
= control target key end

     0   :  { %v604_v1 = vmov 0   ;;  %v605_v3 = vmov 0.0   ;;  %v72_v5 = vlaneseq  ;;  %v606_v8 = vmov 1966171168   ;;  %s786_s0 = inlined_call_operand.vmem [shape: bf16[2,192], index: 0, kind: input, shape index: {}]   ;;  %s787_s1 = inlined_call_operand.vmem [shape: bf16[192,120], index: 1, kind: input, shape index: {}]   ;;  %s788_s2 = inlined_call_operand.vmem [shape: f32[1,120], index: 2, kind: input, shape index: {}]   ;;  %s789_s3 = inlined_call_operand.vmem [shape: bf16[120,100], index: 3, kind: input, shape index: {}]   ;;  %s790_s4 = inlined_call_operand.vmem [shape: f32[1,100], index: 4, kind: input, shape index: {}]   ;;  %s791_s5 = inlined_call_operand.vmem [shape: bf16[100,10], index: 5, kind: input, shape index: {}]   ;;  %s792_s6 = inlined_call_operand.vmem [shape: f32[1,10], index: 6, kind: input, shape index: {}]   ;;  %s793_s7 = inlined_call_operand.hbm [shape: f32[2,10], index: 7, kind: output, shape index: {}]  }
   0x1   :  { %v549_v0 = vld [vmem:[%s787_s1] sm:$0xff]   ;;  %160 = vmatprep.subr.bf16.mxu0 %v604_v1  ;;  %v550_v2 = vld [vmem:[%s787_s1 + $0x8] sm:$0xff]   ;;  %506 = vmatprep.subr.bf16.mxu1 %v605_v3  ;;  %v551_v4 = vld [vmem:[%s787_s1 + $0x10] sm:$0xff]   ;;  %v70_v9 = vunpack.c.l.s4 %v606_v8  ;;  %vm156_vm0 = vcmask 523264  }
   0x2   :  { %161 = vmatpush1.bf16.msra.mxu0 %v549_v0  ;;  %v552_v6 = vld [vmem:[%s787_s1 + $0x18] sm:$0xff]   ;;  %v456_v7 = vld.sshfl [vmem:[%s786_s0] sm:$0x11 pattern:$0x75316420]  ;;  %v73_v10 = vshrl.u32 %v72_v5, 7 }
   0x3   :  { %162 = vmatprep.subr.bf16.mxu0 %v604_v1  ;;  %v561_v11 = vld [vmem:[%s789_s3] sm:$0xff]   ;;  %v68_v13 = vcombine.high %v456_v7, %v456_v7  ;;  %v71_v14 = vunpack.c.0.s8 %v70_v9  ;;  %v562_v15 = vld [vmem:[%s789_s3 + $0x8] sm:$0xff]   ;;  %v563_v19 = vld [vmem:[%s789_s3 + $0x10] sm:$0xff]  }
   0x4   :  { %v553_v12 = vld [vmem:[%s787_s1 + $0x20] sm:$0xff]   ;;  %507 = vmatpush3.bf16.msra.mxu1 %v561_v11  ;;  %v554_v17 = vld [vmem:[%s787_s1 + $0x28] sm:$0xff]   ;;  %v555_v20 = vld [vmem:[%s787_s1 + $0x30] sm:$0xff]  }
   0x5   :  { %508 = vmatprep.subr.bf16.mxu1 %v605_v3  ;;  %v74_v16 = vsub.s32 %v71_v14, %v73_v10  ;;  %v564_v21 = vld [vmem:[%s789_s3 + $0x18] sm:$0xff]  }
   0x6   :  { %163 = vmatpush1.bf16.msra.mxu0 %v550_v2 }
   0x7   :  { %164 = vmatprep.subr.bf16.mxu0 %v604_v1  ;;  %v82_v18 = vrot.slane %v68_v13, %v74_v16 }
   0x8   :  { %509 = vmatpush3.bf16.msra.mxu1 %v562_v15 }
   0x9   :  { %510 = vmatprep.subr.bf16.mxu1 %v605_v3  ;;  %469 = vmatprep.mubr.msk.bf16.mxu0 %vm156_vm0, %v82_v18 }
   0xa   :  { %165 = vmatpush1.bf16.msra.mxu0 %v551_v4 }
   0xb   :  { %166 = vmatprep.subr.bf16.mxu0 %v604_v1 }
   0xc   :  { %511 = vmatpush3.bf16.msra.mxu1 %v563_v19 }
   0xd   :  { %512 = vmatprep.subr.bf16.mxu1 %v605_v3 }
   0xe   :  { %167 = vmatpush1.bf16.msra.mxu0 %v552_v6 }
   0xf   :  { %168 = vmatprep.subr.bf16.mxu0 %v604_v1 }
  0x12   :  { %169 = vmatpush1.bf16.msra.mxu0 %v553_v12 }
  0x13   :  { %170 = vmatprep.subr.bf16.mxu0 %v604_v1 }
  0x16   :  { %171 = vmatpush1.bf16.msra.mxu0 %v554_v17 }
  0x17   :  { %172 = vmatprep.subr.bf16.mxu0 %v604_v1 }
  0x18   :  { %12 = vsyncpa [#allocation3], 0  ;;  %v556_v22 = vld [vmem:[%s787_s1 + $0x38] sm:$0xff]   ;;  %513 = vmatpush3.bf16.msra.mxu1 %v564_v21  ;;  %v565_v23 = vld [vmem:[%s789_s3 + $0x20] sm:$0xff]   ;;  %v75_v29 = vrot.slane %v456_v7, %v74_v16  ;;  %vm273_vm1 = vcmask 1043456   ;;  %vm607_vm2 = vmmov 0  }
  0x19   :  { %514 = vmatprep.subr.bf16.mxu1 %v605_v3  ;;  %v557_v24 = vld [vmem:[%s787_s1 + $0x40] sm:$0xff]   ;;  %v566_v25 = vld [vmem:[%s789_s3 + $0x28] sm:$0xff]   ;;  %v559_v27 = vld [vmem:[%s787_s1 + $0x50] sm:$0xff]   ;;  %522 = vmatprep.mubr.msk.bf16.mxu1 %vm607_vm2, %v605_v3  ;;  %vm269_vm3 = vcmask 982016   ;;  %vm382_vm4 = vcmask 1041408   ;;  %vm378_vm5 = vcmask 818176  }
  0x1a   :  { %173 = vmatpush1.bf16.msra.mxu0 %v555_v20  ;;  %v558_v26 = vld [vmem:[%s787_s1 + $0x48] sm:$0xff]   ;;  %v560_v28 = vld [vmem:[%s787_s1 + $0x58] sm:$0xff]   ;;  %v567_v30 = vld [vmem:[%s789_s3 + $0x30] sm:$0xff]   ;;  %vm426_vm6 = vcmask 74752  }
  0x1b   :  { %174 = vmatprep.subr.bf16.mxu0 %v604_v1  ;;  %v568_v31 = vld [vmem:[%s789_s3 + $0x38] ss:$0 sps:$4 sm:$0xff]   ;;  %v455_v33 = vld [vmem:[%s788_s2] ss:$0 sm:$0xff]  ;;  %v570_v42 = vld [vmem:[%s791_s5 + $0x8] sm:$0xff]  }
  0x1c   :  { %515 = vmatpush3.bf16.msra.mxu1 %v565_v23  ;;  %v275_v32 = vsel %vm273_vm1, %v568_v31, 0  ;;  %v569_v40 = vld [vmem:[%s791_s5] sm:$0xff]   ;;  %v571_v43 = vld [vmem:[%s791_s5 + $0x10] sm:$0xff]   ;;  %v572_v44 = vld [vmem:[%s791_s5 + $0x18] sm:$0xff]  }
  0x1d   :  { %516 = vmatprep.subr.bf16.mxu1 %v605_v3  ;;  %v573_v45 = vld [vmem:[%s791_s5 + $0x20] sm:$0xff]   ;;  %v574_v46 = vld [vmem:[%s791_s5 + $0x28] sm:$0xff]   ;;  %v575_v47 = vld [vmem:[%s791_s5 + $0x30] ss:$0 sps:$4 sm:$0x33]  }
  0x1e   :  { %175 = vmatpush1.bf16.msra.mxu0 %v556_v22  ;;  %v384_v48 = vsel %vm382_vm4, %v575_v47, 0  ;;  %v470_v49 = vld [vmem:[%s790_s4] ss:$0 sm:$0xff]  ;;  %s608_s4 = smov [#allocation2]  }
  0x1f   :  { %176 = vmatprep.subr.bf16.mxu0 %v604_v1  ;;  %v480_v57 = vld [vmem:[%s792_s6] ss:$0 sm:$0xff]  ;;  %s447_s5 = sshll.u32 %s608_s4, 4  ;;  %s448_s5 = int_to_ptr.vmem [resolvable:$true] %s447_s5 }
  0x20   :  { %517 = vmatpush3.bf16.msra.mxu1 %v566_v25  ;;  %s580_s6 = scalar_lea.vmem %s448_s5, 32  ;;  %p585_p1 = scmp.lt.s32.totalorder %s448_s5, %s448_s5 }
  0x21   :  { %518 = vmatprep.subr.bf16.mxu1 %v605_v3  ;;  %p581_p0 = scmp.ne.s32.totalorder %s448_s5, %s580_s6  ;;  %p586_p2 = scmp.lt.s32.totalorder %s580_s6, %s580_s6 }
  0x22   :  { %177 = vmatpush1.bf16.msra.mxu0 %v557_v24 }
  0x23   :  { %178 = vmatprep.subr.bf16.mxu0 %v604_v1  ;;  %p587_p3 = por %p586_p2, %p585_p1 }
  0x24   :  { %519 = vmatpush3.bf16.msra.mxu1 %v567_v30 }
  0x25   :  { %520 = vmatprep.subr.bf16.mxu1 %v605_v3  ;;  %p588_p4 = pnand %p587_p3, %p581_p0 }
  0x26   :  { %179 = vmatpush1.bf16.msra.mxu0 %v558_v26 }
  0x27   :  { %180 = vmatprep.subr.bf16.mxu0 %v604_v1 }
  0x28   :  { %521 = vmatpush3.bf16.msra.mxu1 %v275_v32 }
  0x29   :  { %526 = vmatprep.subr.bf16.mxu1 %v605_v3 }
  0x2a   :  { %181 = vmatpush1.bf16.msra.mxu0 %v559_v27 }
  0x2b   :  { %182 = vmatprep.subr.bf16.mxu0 %v604_v1 }
  0x2e   :  { %183 = vmatpush1.bf16.msra.mxu0 %v560_v28 }
  0x31   :  { %193 = vmatmul.mubr.bf16.vlgmr.msra.gmra.mrb[0].mxu0 %v75_v29 }
 0x104   :  { %v194_v34 = vpop.f32.mrb[0].mxu0 }
 0x105   :  { %v195_v35 = vadd.f32 %v455_v33, %v194_v34  ;;  %v196_v36 = vpop.f32.mrb[1].mxu0 }
 0x106   :  { %v197_v37 = vpop.f32.mrb[2].mxu0 }
 0x107   :  { %v200_v38 = vmax.f32 %v195_v35, 0.0  ;;  %v198_v39 = vpop.f32.mrb[3].mxu0 }
 0x109   :  { %v201_v41 = vpack.c.bf16 %v200_v38, %v200_v38 }
 0x10b   :  { %523 = vmatmul.mubr.msk.bf16.vlgmr.msra.gmra.mrb[0].mxu1 %vm269_vm3, %v201_v41 }
 0x10c   :  { %527 = vmatpush3.bf16.msra.mxu1 %v569_v40  ;;  %540 = vmatprep.mubr.msk.bf16.mxu1 %vm607_vm2, %v605_v3 }
 0x10d   :  { %528 = vmatprep.subr.bf16.mxu1 %v605_v3 }
 0x110   :  { %529 = vmatpush3.bf16.msra.mxu1 %v570_v42 }
 0x111   :  { %530 = vmatprep.subr.bf16.mxu1 %v605_v3 }
 0x114   :  { %531 = vmatpush3.bf16.msra.mxu1 %v571_v43 }
 0x115   :  { %532 = vmatprep.subr.bf16.mxu1 %v605_v3 }
 0x118   :  { %533 = vmatpush3.bf16.msra.mxu1 %v572_v44 }
 0x119   :  { %534 = vmatprep.subr.bf16.mxu1 %v605_v3 }
 0x11c   :  { %535 = vmatpush3.bf16.msra.mxu1 %v573_v45 }
 0x11d   :  { %536 = vmatprep.subr.bf16.mxu1 %v605_v3 }
 0x120   :  { %537 = vmatpush3.bf16.msra.mxu1 %v574_v46 }
 0x121   :  { %538 = vmatprep.subr.bf16.mxu1 %v605_v3 }
 0x124   :  { %539 = vmatpush3.bf16.msra.mxu1 %v384_v48 }
 0x1de   :  { %v311_v50 = vpop.f32.mrb[0].mxu1 }
 0x1df   :  { %v312_v51 = vadd.f32 %v470_v49, %v311_v50  ;;  %v524_v52 = vpop.f32.mrb[1].mxu1 }
 0x1e0   :  { %v314_v53 = vpop.f32.mrb[2].mxu1 }
 0x1e1   :  { %v317_v54 = vmax.f32 %v312_v51, 0.0  ;;  %v525_v55 = vpop.f32.mrb[3].mxu1 }
 0x1e3   :  { %v318_v56 = vpack.c.bf16 %v317_v54, %v317_v54 }
 0x1e5   :  { %541 = vmatmul.mubr.msk.bf16.vlgmr.msra.gmra.mrb[4].mxu1 %vm378_vm5, %v318_v56 }
 0x2b8   :  { %v420_v58 = vpop.f32.mrb[4].mxu1 }
 0x2b9   :  { %v421_v59 = vadd.f32 %v480_v57, %v420_v58  ;;  %v542_v60 = vpop.f32.mrb[5].mxu1 }
 0x2ba   :  { %v423_v61 = vpop.f32.mrb[6].mxu1 }
 0x2bb   :  { %v543_v62 = vpop.f32.mrb[7].mxu1  ;;  %v427_v63 = vsel %vm426_vm6, %v421_v59, -inf }
 0x2bc   :  { %428 = vmax.xlane.f32.xlu0 %v427_v63 }
 0x349   :  { %v429_v0 = vpop.xlane.xlu0 %428 }
 0x34a   :  { %v430_v1 = vsub.f32 %v421_v59, %v429_v0 }
 0x34c   :  { %v431_v2 = vmul.f32 1.442695, %v430_v1 }
 0x34e   :  { %576 = vpow2.f32 %v431_v2 }
 0x358   :  { %v577_v3 = vpop.eup %576 }
 0x359   :  { %v433_v4 = vsel %vm426_vm6, %v577_v3, 0.0 }
 0x35a   :  { %434 = vadd.xlane.f32.xlu0 %v433_v4 }
 0x3e7   :  { %v435_v5 = vpop.xlane.xlu0 %434 }
 0x3e8   :  { %578 = vlog2.f32 %v435_v5 }
 0x3f2   :  { %v579_v6 = vpop.eup %578 }
 0x3f3   :  { %v437_v7 = vmul.f32 0.6931472, %v579_v6 }
 0x3f5   :  { %v438_v8 = vadd.f32 %v437_v7, %v429_v0 }
 0x3f7   :  { %v439_v9 = vsub.f32 %v421_v59, %v438_v8 }
 0x3f9   :  { %440 = vst.msk [vmem:[#allocation2] sm:$0x3] %vm426_vm6, %v439_v9 }
 0x3fa   :  { %591 = shalt.err (!%p588_p4)
}
 0x3fb   :  { %s592_s14 = scalar_lea.hbm %s793_s7, 32 }
 0x3fc   :  { %p593_p5 = scmp.ne.s32.totalorder %s793_s7, %s592_s14  ;;  %p596_p6 = scmp.lt.u32.totalorder %s592_s14, %s793_s7 }
 0x3fe   :  { %p598_p7 = pnand %p596_p6, %p593_p5 }
 0x400   :  { %601 = shalt.err (!%p598_p7)
}
 0x401   :  { %450 = dma.vmem_to_hbm [thread:$0]  %s448_s5, 32, %s793_s7, [#allocation3]  }
 0x402   :  { %602 = dma.done.wait [#allocation3], 32  }
 0x403   :  { %603 = vsyncadd [#allocation3], 4294967264 }
 0x404   :  { %454 = vsyncpa [#allocation3], 1 }

</bundles_post_ra>
